<compile_context>
chip_gen: v7x
topology: tpu7x:2x2x1
jax: 0.10.0
libtpu: 0.0.40
codegen_flags: <defaults>
</compile_context>

<pallas_src>
import functools
import math

import jax
import jax.numpy as jnp
from jax import lax
from jax.experimental import pallas as pl
from jax.experimental.pallas import tpu as pltpu


# ----------------------------------------------------------------------------
# helpers
# ----------------------------------------------------------------------------
def _round_up(n, m):
    return ((n + m - 1) // m) * m


def _pick_vocab_tile(v, cap=2048):
    """Lane-dense vocab tile: multiple of 128 (or the full dim if v < 128)."""
    if v < 128:
        return v
    return min(cap, (v // 128) * 128)


# ----------------------------------------------------------------------------
# Kernel A: fused linear (+ bias, + optional tanh)
#           grid = (row tiles [parallel], contraction tiles [arbitrary])
#           f32 VMEM accumulator; bias/activation applied on the last K step.
# ----------------------------------------------------------------------------
def _linear_kernel(x_ref, w_ref, b_ref, o_ref, acc_ref, *, activation, kin, tk,
                   mask_k):
    k = pl.program_id(1)

    @pl.when(k == 0)
    def _():
        acc_ref[...] = jnp.zeros_like(acc_ref)

    x = x_ref[...]
    w = w_ref[...]
    if mask_k:
        # Edge K-tile: zero out-of-range contraction columns/rows so padded
        # (undefined) data cannot pollute the accumulation.
        col = k * tk + lax.broadcasted_iota(jnp.int32, x.shape, 1)
        x = jnp.where(col < kin, x, 0.0)
        row = k * tk + lax.broadcasted_iota(jnp.int32, w.shape, 0)
        w = jnp.where(row < kin, w, 0.0)

    acc_ref[...] += jnp.dot(x, w, preferred_element_type=jnp.float32)

    @pl.when(k == pl.num_programs(1) - 1)
    def _():
        y = acc_ref[...] + b_ref[...]
        if activation == "tanh":
            y = jnp.tanh(y)
        o_ref[...] = y.astype(o_ref.dtype)


def pallas_linear(x, w, b, activation=None, row_tile=256, k_tile=512):
    M, Kin = x.shape
    Kw, N = w.shape
    assert Kin == Kw
    tm = min(row_tile, _round_up(M, 8))
    tk = Kin if Kin <= k_tile else k_tile          # k_tile is a multiple of 128
    mask_k = (Kin % tk) != 0
    grid = (pl.cdiv(M, tm), pl.cdiv(Kin, tk))
    kernel = functools.partial(_linear_kernel, activation=activation, kin=Kin,
                               tk=tk, mask_k=mask_k)
    return pl.pallas_call(
        kernel,
        out_shape=jax.ShapeDtypeStruct((M, N), jnp.float32),
        grid=grid,
        in_specs=[
            pl.BlockSpec((tm, tk), lambda m, k: (m, k)),
            pl.BlockSpec((tk, N), lambda m, k: (k, 0)),
            pl.BlockSpec((1, N), lambda m, k: (0, 0)),
        ],
        out_specs=pl.BlockSpec((tm, N), lambda m, k: (m, 0)),
        scratch_shapes=[pltpu.VMEM((tm, N), jnp.float32)],
        compiler_params=pltpu.CompilerParams(
            dimension_semantics=("parallel", "arbitrary")),
    )(x, w, b.reshape(1, N))


# ----------------------------------------------------------------------------
# Kernel B: per-row KL( N(q_mu, q_logsigma) || N(p_mu, p_logsigma) )
# ----------------------------------------------------------------------------
def _kl_kernel(qmu_ref, qls_ref, pmu_ref, pls_ref, o_ref):
    q_mu, q_ls = qmu_ref[...], qls_ref[...]
    p_mu, p_ls = pmu_ref[...], pls_ref[...]
    kl = (jnp.exp(q_ls) + (q_mu - p_mu) ** 2) / (jnp.exp(p_ls) + 1e-6)
    kl = kl - 1.0 + p_ls - q_ls
    o_ref[...] = 0.5 * jnp.sum(kl, axis=-1, keepdims=True)


def pallas_kl(q_mu, q_logsigma, p_mu, p_logsigma, row_tile=256):
    # NOTE: caller only consumes .sum(); a full in-kernel scalar reduction is a
    # modest further win but would force the row axis to "arbitrary" -- keep
    # the (N,1) per-row output and the parallel row axis.
    N, D = q_mu.shape
    tn = min(row_tile, _round_up(N, 8))
    grid = (pl.cdiv(N, tn),)
    out = pl.pallas_call(
        _kl_kernel,
        out_shape=jax.ShapeDtypeStruct((N, 1), jnp.float32),
        grid=grid,
        in_specs=[pl.BlockSpec((tn, D), lambda i: (i, 0)) for _ in range(4)],
        out_specs=pl.BlockSpec((tn, 1), lambda i: (i, 0)),
        compiler_params=pltpu.CompilerParams(dimension_semantics=("parallel",)),
    )(q_mu, q_logsigma, p_mu, p_logsigma)
    return out[:, 0]


# ----------------------------------------------------------------------------
# Kernel C1: beta logits (alpha @ rho^T) tiled over vocab + online logsumexp.
#            rho is fed PRE-TRANSPOSED as (R, V) -> lane-dense (R, TV) tiles
#            and a direct (K,R)x(R,TV) MXU matmul.
# ----------------------------------------------------------------------------
def _beta_logits_kernel(alpha_ref, rhot_ref, logit_ref, lse_ref, m_sc, s_sc,
                        *, V, TV):
    v = pl.program_id(0)

    @pl.when(v == 0)
    def _():
        m_sc[...] = jnp.full_like(m_sc, -jnp.inf)
        s_sc[...] = jnp.zeros_like(s_sc)

    logit = jnp.dot(alpha_ref[...], rhot_ref[...],
                    preferred_element_type=jnp.float32)          # (K, TV)
    col = v * TV + lax.broadcasted_iota(jnp.int32, logit.shape, 1)
    valid = col < V
    masked = jnp.where(valid, logit, -jnp.inf)                   # guard edge tile
    m_new = jnp.maximum(m_sc[...], jnp.max(masked, axis=-1, keepdims=True))
    s_sc[...] = s_sc[...] * jnp.exp(m_sc[...] - m_new) + jnp.sum(
        jnp.exp(masked - m_new), axis=-1, keepdims=True)
    m_sc[...] = m_new

    # Mask the write so padded columns never carry garbage/inf downstream.
    logit_ref[...] = jnp.where(valid, logit, 0.0)

    @pl.when(v == pl.num_programs(0) - 1)
    def _():
        lse_ref[...] = m_sc[...] + jnp.log(s_sc[...])


# Kernel C2: tiny second pass -> beta = exp(logits - lse), computed ONCE
#            (removes the exp from the NLL inner loop entirely).
def _beta_norm_kernel(logit_ref, lse_ref, beta_ref):
    beta_ref[...] = jnp.exp(logit_ref[...] - lse_ref[...])


def pallas_beta(alpha, rho, vocab_tile=2048):
    K, R = alpha.shape
    V, R2 = rho.shape
    assert R == R2
    rho_t = rho.T                                  # (R, V) -- layout plumbing only
    TV = _pick_vocab_tile(V, vocab_tile)
    grid = (pl.cdiv(V, TV),)

    kernel = functools.partial(_beta_logits_kernel, V=V, TV=TV)
    logits, lse = pl.pallas_call(
        kernel,
        out_shape=(jax.ShapeDtypeStruct((K, V), jnp.float32),
                   jax.ShapeDtypeStruct((K, 1), jnp.float32)),
        grid=grid,
        in_specs=[
            pl.BlockSpec((K, R), lambda v: (0, 0)),
            pl.BlockSpec((R, TV), lambda v: (0, v)),
        ],
        out_specs=(
            pl.BlockSpec((K, TV), lambda v: (0, v)),
            pl.BlockSpec((K, 1), lambda v: (0, 0)),
        ),
        scratch_shapes=[pltpu.VMEM((K, 1), jnp.float32),
                        pltpu.VMEM((K, 1), jnp.float32)],
        compiler_params=pltpu.CompilerParams(dimension_semantics=("arbitrary",)),
    )(alpha, rho_t)

    beta = pl.pallas_call(
        _beta_norm_kernel,
        out_shape=jax.ShapeDtypeStruct((K, V), jnp.float32),
        grid=grid,
        in_specs=[
            pl.BlockSpec((K, TV), lambda v: (0, v)),
            pl.BlockSpec((K, 1), lambda v: (0, 0)),
        ],
        out_specs=pl.BlockSpec((K, TV), lambda v: (0, v)),
        compiler_params=pltpu.CompilerParams(dimension_semantics=("parallel",)),
    )(logits, lse)
    return beta


# ----------------------------------------------------------------------------
# Kernel D: per-document NLL   nll_d = -sum_v log(theta @ beta)_dv * bow_dv
#           grid = (doc tiles [parallel], vocab tiles [arbitrary/accumulated])
# ----------------------------------------------------------------------------
def _nll_kernel(theta_ref, beta_ref, bows_ref, o_ref, acc_ref, *, V, TV):
    v = pl.program_id(1)

    @pl.when(v == 0)
    def _():
        acc_ref[...] = jnp.zeros_like(acc_ref)

    probs = jnp.dot(theta_ref[...], beta_ref[...],
                    preferred_element_type=jnp.float32)           # (td, TV)
    col = v * TV + lax.broadcasted_iota(jnp.int32, probs.shape, 1)
    term = jnp.where(col < V,
                     jnp.log(probs) * bows_ref[...].astype(jnp.float32), 0.0)
    acc_ref[...] = acc_ref[...] - jnp.sum(term, axis=-1, keepdims=True)

    @pl.when(v == pl.num_programs(1) - 1)
    def _():
        o_ref[...] = acc_ref[...]


def pallas_nll(theta, beta, bows, row_tile=256, vocab_tile=2048):
    D, K = theta.shape
    K2, V = beta.shape
    assert K == K2 and bows.shape == (D, V)
    # bows is the dominant HBM stream of this mem-bound kernel; bf16 is exact
    # for word counts <= 256.
    # TODO(synk): ideally the data pipeline provides bows already as bf16/int
    # so this cast is not a separate XLA pass.
    bows = bows.astype(jnp.bfloat16)
    td = min(row_tile, _round_up(D, 8))
    TV = _pick_vocab_tile(V, vocab_tile)
    grid = (pl.cdiv(D, td), pl.cdiv(V, TV))
    kernel = functools.partial(_nll_kernel, V=V, TV=TV)
    out = pl.pallas_call(
        kernel,
        out_shape=jax.ShapeDtypeStruct((D, 1), jnp.float32),
        grid=grid,
        in_specs=[
            pl.BlockSpec((td, K), lambda d, v: (d, 0)),
            pl.BlockSpec((K, TV), lambda d, v: (0, v)),
            pl.BlockSpec((td, TV), lambda d, v: (d, v)),
        ],
        out_specs=pl.BlockSpec((td, 1), lambda d, v: (d, 0)),
        scratch_shapes=[pltpu.VMEM((td, 1), jnp.float32)],
        compiler_params=pltpu.CompilerParams(
            dimension_semantics=("parallel", "arbitrary")),
    )(theta, beta, bows)
    return out[:, 0]


# ----------------------------------------------------------------------------
# Plain-JAX pieces shared by the Pallas model and the pure-JAX reference
# ----------------------------------------------------------------------------
def _linear_jnp(x, w, b, act=None):
    y = x @ w + b
    if act == "tanh":
        y = jnp.tanh(y)
    return y


def _kl_gauss(q_mu, q_ls, p_mu, p_ls):
    kl = (jnp.exp(q_ls) + (q_mu - p_mu) ** 2) / (jnp.exp(p_ls) + 1e-6)
    kl = kl - 1.0 + p_ls - q_ls
    return 0.5 * jnp.sum(kl, axis=-1)


def _conditional_clamp(x, lo, hi):
    # Replicates the module's data-dependent `if any>max: clamp-high elif any<min: clamp-low`.
    any_hi = jnp.any(x > hi)
    any_lo = jnp.any(x < lo)
    x = jnp.where(any_hi, jnp.minimum(x, hi), x)
    x = jnp.where(jnp.logical_and(jnp.logical_not(any_hi), any_lo),
                  jnp.maximum(x, lo), x)
    return x


def _lstm(inp, params):
    # TODO(synk): sequential LSTM recurrence kept in lax.scan (no clean Pallas
    # single-kernel equivalent at these tiny per-step shapes).
    S, T, He = inp.shape
    Wih, Whh = params["lstm_wih"], params["lstm_whh"]
    bias = params["lstm_bih"] + params["lstm_bhh"]

    def step(carry, x_t):
        h, c = carry
        gates = x_t @ Wih + h @ Whh + bias
        i, f, g, o = jnp.split(gates, 4, axis=-1)
        i, f, o = jax.nn.sigmoid(i), jax.nn.sigmoid(f), jax.nn.sigmoid(o)
        g = jnp.tanh(g)
        c = f * c + i * g
        h = o * jnp.tanh(c)
        return (h, c), h

    h0 = jnp.zeros((S, He), jnp.float32)
    (_, _), hs = lax.scan(step, (h0, jnp.zeros_like(h0)), jnp.swapaxes(inp, 0, 1))
    return jnp.swapaxes(hs, 0, 1)  # (S, T, He)


# ----------------------------------------------------------------------------
# MixMedia forward (eval mode): use_pallas toggles kernels vs pure-JAX reference
# ----------------------------------------------------------------------------
def mixmedia_forward(params, cfg, bows, normalized_bows, times, sources,
                     rnn_inp, num_docs, *, use_pallas=True):
    K = cfg["num_topics"]
    delta = cfg["delta"]
    min_ls, max_ls = cfg["min_logsigma_t"], cfg["max_logsigma_t"]

    if use_pallas:
        linear = lambda x, w, b, act=None: pallas_linear(x, w, b, activation=act)
        kl_rows = lambda qm, ql, pm, plg: pallas_kl(qm, ql, pm, plg)
    else:
        linear = _linear_jnp
        kl_rows = _kl_gauss

    bsz = normalized_bows.shape[0]
    coeff = num_docs / bsz

    # ---- get_alpha (eval: reparameterize -> mu) ----
    alpha = params["mu_q_alpha"]
    zeros_a = jnp.zeros_like(alpha)
    kl_alpha = kl_rows(params["mu_q_alpha"], params["logsigma_q_alpha"],
                       zeros_a, zeros_a).sum()

    # ---- get_eta ----
    S, T, V = rnn_inp.shape
    mapped = linear(rnn_inp.reshape(S * T, V),
                    params["q_eta_map_w"], params["q_eta_map_b"]).reshape(S, T, -1)
    output = _lstm(mapped, params)

    W_mu, b_mu = params["mu_q_eta_w"], params["mu_q_eta_b"]
    W_ls, b_ls = params["logsigma_q_eta_w"], params["logsigma_q_eta_b"]

    inp_0 = jnp.concatenate([output[:, 0, :], jnp.zeros((S, K), jnp.float32)], axis=1)
    mu_0 = inp_0 @ W_mu + b_mu
    ls_0 = inp_0 @ W_ls + b_ls
    eta_0 = mu_0
    kl_eta_0 = _kl_gauss(mu_0, ls_0, jnp.zeros_like(mu_0), jnp.zeros_like(ls_0)).sum()

    # TODO(synk): autoregressive eta loop (eta_{t-1} feeds the next step) kept
    # as lax.scan with tiny jnp matmuls -- not a good fit for one Pallas kernel.
    def eta_step(carry, out_t):
        eta_prev, kl_acc = carry
        inp_t = jnp.concatenate([out_t, eta_prev], axis=1)
        mu_t = inp_t @ W_mu + b_mu
        ls_t = _conditional_clamp(inp_t @ W_ls + b_ls, min_ls, max_ls)
        p_ls_t = jnp.full_like(mu_t, math.log(delta))
        kl_t = _kl_gauss(mu_t, ls_t, eta_prev, p_ls_t).sum()
        return (mu_t, kl_acc + kl_t), mu_t

    (_, kl_eta), etas_rest = lax.scan(eta_step, (eta_0, kl_eta_0),
                                      jnp.swapaxes(output[:, 1:, :], 0, 1))
    eta = jnp.concatenate([eta_0[:, None, :], jnp.swapaxes(etas_rest, 0, 1)], axis=1)

    # ---- get_theta (enc_drop = 0, eval mode) ----
    eta_std = eta[sources, times]                                  # (bsz, K)
    inp = jnp.concatenate([normalized_bows, eta_std], axis=1)
    h = linear(inp, params["q_theta_w1"], params["q_theta_b1"], "tanh")
    h = linear(h, params["q_theta_w2"], params["q_theta_b2"], "tanh")

    if use_pallas:
        # Fuse the mu / logsigma heads into one kernel launch (concatenated N).
        head_w = jnp.concatenate([params["mu_q_theta_w"],
                                  params["logsigma_q_theta_w"]], axis=1)
        head_b = jnp.concatenate([params["mu_q_theta_b"],
                                  params["logsigma_q_theta_b"]])
        heads = pallas_linear(h, head_w, head_b)
        mu_theta, ls_theta_raw = heads[:, :K], heads[:, K:]
    else:
        mu_theta = _linear_jnp(h, params["mu_q_theta_w"], params["mu_q_theta_b"])
        ls_theta_raw = _linear_jnp(h, params["logsigma_q_theta_w"],
                                   params["logsigma_q_theta_b"])
    ls_theta = _conditional_clamp(ls_theta_raw, min_ls, max_ls)
    theta = jax.nn.softmax(mu_theta, axis=-1)
    kl_theta = kl_rows(mu_theta, ls_theta, eta_std, jnp.zeros_like(ls_theta)).sum() * coeff

    # ---- get_beta + get_nll (beta normalized once, NLL streams bows) ----
    if use_pallas:
        beta = pallas_beta(alpha, params["rho"])
        nll_doc = pallas_nll(theta, beta, bows)
    else:
        beta = jax.nn.softmax(alpha @ params["rho"].T, axis=-1)
        nll_doc = -(jnp.log(theta @ beta) * bows).sum(-1)
    nll = nll_doc.sum() * coeff

    # predict_labels=False / predict_cnpi=False configuration of the module.
    # TODO(synk): classifier / CNPI-LSTM prediction-loss branches not exercised.
    pred_loss = jnp.float32(0.0)
    cnpi_pred_loss = jnp.float32(0.0)
    nelbo = nll + kl_alpha + kl_eta + kl_theta
    return nelbo, nll, kl_alpha, kl_eta, kl_theta, pred_loss, cnpi_pred_loss


# ----------------------------------------------------------------------------
# parameter init (deterministic)
# ----------------------------------------------------------------------------
def init_params(key, cfg):
    K, V, R = cfg["num_topics"], cfg["vocab_size"], cfg["rho_size"]
    Ht, He = cfg["t_hidden_size"], cfg["eta_hidden_size"]
    keys = jax.random.split(key, 16)

    def dense(k, fi, fo):
        s = 1.0 / math.sqrt(fi)
        return jax.random.uniform(k, (fi, fo), jnp.float32, -s, s)

    p = {
        "rho": jax.random.normal(keys[0], (V, R), jnp.float32) * 0.3,
        "mu_q_alpha": jax.random.normal(keys[1], (K, R), jnp.float32),
        "logsigma_q_alpha": jax.random.normal(keys[2], (K, R), jnp.float32),
        "q_theta_w1": dense(keys[3], V + K, Ht),
        "q_theta_b1": jnp.zeros((Ht,), jnp.float32),
        "q_theta_w2": dense(keys[4], Ht, Ht),
        "q_theta_b2": jnp.zeros((Ht,), jnp.float32),
        "mu_q_theta_w": dense(keys[5], Ht, K),
        "mu_q_theta_b": jnp.zeros((K,), jnp.float32),
        "logsigma_q_theta_w": dense(keys[6], Ht, K),
        "logsigma_q_theta_b": jnp.zeros((K,), jnp.float32),
        "q_eta_map_w": dense(keys[7], V, He),
        "q_eta_map_b": jnp.zeros((He,), jnp.float32),
        "lstm_wih": dense(keys[8], He, 4 * He),
        "lstm_whh": dense(keys[9], He, 4 * He),
        "lstm_bih": jnp.zeros((4 * He,), jnp.float32),
        "lstm_bhh": jnp.zeros((4 * He,), jnp.float32),
        "mu_q_eta_w": dense(keys[10], He + K, K),
        "mu_q_eta_b": jnp.zeros((K,), jnp.float32),
        "logsigma_q_eta_w": dense(keys[11], He + K, K),
        "logsigma_q_eta_b": jnp.zeros((K,), jnp.float32),
    }
    return p


# ----------------------------------------------------------------------------
if __name__ == "__main__":
    cfg = dict(num_topics=8, vocab_size=1024, rho_size=32, t_hidden_size=32,
               eta_hidden_size=32, num_times=4, num_sources=2,
               delta=0.005, max_logsigma_t=10.0, min_logsigma_t=-10.0)
    bsz, num_docs = 8, 64

    key = jax.random.PRNGKey(0)
    k_param, k_bows, k_rnn, k_t, k_s = jax.random.split(key, 5)
    params = init_params(k_param, cfg)

    V, S, T = cfg["vocab_size"], cfg["num_sources"], cfg["num_times"]
    bows = jax.random.randint(k_bows, (bsz, V), 0, 5).astype(jnp.float32)
    normalized_bows = bows / jnp.maximum(bows.sum(-1, keepdims=True), 1.0)
    rnn_inp = jax.random.uniform(k_rnn, (S, T, V), jnp.float32)
    rnn_inp = rnn_inp / rnn_inp.sum(-1, keepdims=True)
    times = jax.random.randint(k_t, (bsz,), 0, T)
    sources = jax.random.randint(k_s, (bsz,), 0, S)

    @jax.jit
    def fwd_pallas(params, bows, nbows, times, sources, rnn_inp):
        return mixmedia_forward(params, cfg, bows, nbows, times, sources,
                                rnn_inp, num_docs, use_pallas=True)

    @jax.jit
    def fwd_ref(params, bows, nbows, times, sources, rnn_inp):
        return mixmedia_forward(params, cfg, bows, nbows, times, sources,
                                rnn_inp, num_docs, use_pallas=False)

    out_p = jax.block_until_ready(
        fwd_pallas(params, bows, normalized_bows, times, sources, rnn_inp))
    out_r = jax.block_until_ready(
        fwd_ref(params, bows, normalized_bows, times, sources, rnn_inp))

    names = ["nelbo", "nll", "kl_alpha", "kl_eta", "kl_theta",
             "pred_loss", "cnpi_pred_loss"]
    for name, a, b in zip(names, out_p, out_r):
        if not bool(jnp.allclose(a, b, rtol=5e-3, atol=1e-2)):
            raise AssertionError(f"{name}: pallas={float(a)} ref={float(b)}")
        if not bool(jnp.isfinite(a)):
            raise AssertionError(f"{name} is not finite: {float(a)}")

    print("KERNEL_OK")
</pallas_src>

<mosaic_0001>
module attributes {stable_mosaic.version = 11 : i64} {
  func.func @_linear_kernel(%arg0: i32, %arg1: i32, %arg2: memref<8x512xf32, #tpu.memory_space<vmem>>, %arg3: memref<512x32xf32, #tpu.memory_space<vmem>>, %arg4: memref<1x32xf32, #tpu.memory_space<vmem>>, %arg5: memref<8x32xf32, #tpu.memory_space<vmem>>, %arg6: memref<8x32xf32, #tpu.memory_space<vmem>>) attributes {dimension_semantics = [#tpu.dimension_semantics<parallel>, #tpu.dimension_semantics<arbitrary>], iteration_bounds = array<i64: 1, 2>, scalar_prefetch = 0 : i64, scratch_operands = 1 : i64, tpu.core_type = #tpu.core_type<tc>, window_params = [{transform_indices = @transform_0, window_bounds = array<i64: 8, 512>}, {transform_indices = @transform_1, window_bounds = array<i64: 512, 32>}, {pipeline_mode = #tpu.pipeline_mode<synchronous>, transform_indices = @transform_2, window_bounds = array<i64: 1, 32>}, {transform_indices = @transform_3, window_bounds = array<i64: 8, 32>}]} {
    %c0_i32 = arith.constant 0 : i32
    %0 = arith.cmpi eq, %arg1, %c0_i32 : i32
    %1 = arith.extui %0 : i1 to i32
    %c0_i32_0 = arith.constant 0 : i32
    %2 = arith.cmpi ne, %1, %c0_i32_0 : i32
    scf.if %2 {
      %cst_9 = arith.constant 0.000000e+00 : f32
      %12 = vector.broadcast %cst_9 : f32 to vector<8x32xf32>
      %c0_10 = arith.constant 0 : index
      %c0_11 = arith.constant 0 : index
      %13 = vector.load %arg6[%c0_10, %c0_11] : memref<8x32xf32, #tpu.memory_space<vmem>>, vector<8x32xf32>
      tpu.vector_store %arg6[%c0_10, %c0_11], %12 {strides = array<i32>} : memref<8x32xf32, #tpu.memory_space<vmem>>, vector<8x32xf32>,
    } else {
    }
    %c0 = arith.constant 0 : index
    %c0_1 = arith.constant 0 : index
    %3 = vector.load %arg2[%c0, %c0_1] : memref<8x512xf32, #tpu.memory_space<vmem>>, vector<8x512xf32>
    %c0_2 = arith.constant 0 : index
    %c0_3 = arith.constant 0 : index
    %4 = vector.load %arg3[%c0_2, %c0_3] : memref<512x32xf32, #tpu.memory_space<vmem>>, vector<512x32xf32>
    %c0_4 = arith.constant 0 : index
    %c0_5 = arith.constant 0 : index
    %5 = vector.load %arg6[%c0_4, %c0_5] : memref<8x32xf32, #tpu.memory_space<vmem>>, vector<8x32xf32>
    %cst = arith.constant dense<0.000000e+00> : vector<8x32xf32>
    %6 = tpu.matmul %3, %4, %cst {dimension_numbers = #tpu.dot_dimension_numbers<[1], [0], [0], [1], [0, 0, 1, 1], [], []>} : vector<8x512xf32>, vector<512x32xf32>, vector<8x32xf32> -> vector<8x32xf32>
    %7 = arith.addf %5, %6 : vector<8x32xf32>
    %c0_6 = arith.constant 0 : index
    %c0_7 = arith.constant 0 : index
    %8 = vector.load %arg6[%c0_6, %c0_7] : memref<8x32xf32, #tpu.memory_space<vmem>>, vector<8x32xf32>
    tpu.vector_store %arg6[%c0_6, %c0_7], %7 {strides = array<i32>} : memref<8x32xf32, #tpu.memory_space<vmem>>, vector<8x32xf32>,
    %c1_i32 = arith.constant 1 : i32
    %9 = arith.cmpi eq, %arg1, %c1_i32 : i32
    %10 = arith.extui %9 : i1 to i32
    %c0_i32_8 = arith.constant 0 : i32
    %11 = arith.cmpi ne, %10, %c0_i32_8 : i32
    scf.if %11 {
      %c0_9 = arith.constant 0 : index
      %c0_10 = arith.constant 0 : index
      %12 = vector.load %arg6[%c0_9, %c0_10] : memref<8x32xf32, #tpu.memory_space<vmem>>, vector<8x32xf32>
      %c0_11 = arith.constant 0 : index
      %c0_12 = arith.constant 0 : index
      %13 = vector.load %arg4[%c0_11, %c0_12] : memref<1x32xf32, #tpu.memory_space<vmem>>, vector<1x32xf32>
      %14 = vector.broadcast %13 : vector<1x32xf32> to vector<8x32xf32>
      %15 = arith.addf %12, %14 : vector<8x32xf32>
      %c0_13 = arith.constant 0 : index
      %c0_14 = arith.constant 0 : index
      %16 = vector.load %arg5[%c0_13, %c0_14] : memref<8x32xf32, #tpu.memory_space<vmem>>, vector<8x32xf32>
      tpu.vector_store %arg5[%c0_13, %c0_14], %15 {strides = array<i32>} : memref<8x32xf32, #tpu.memory_space<vmem>>, vector<8x32xf32>,
    } else {
    }
    return
  }
  func.func @transform_0(%arg0: i32, %arg1: i32) -> (i32, i32) {
    %c0_i32 = arith.constant 0 : i32
    return %arg0, %arg1 : i32, i32
  }
  func.func @transform_1(%arg0: i32, %arg1: i32) -> (i32, i32) {
    %c0_i32 = arith.constant 0 : i32
    %c0_i32_0 = arith.constant 0 : i32
    return %arg1, %c0_i32 : i32, i32
  }
  func.func @transform_2(%arg0: i32, %arg1: i32) -> (i32, i32) {
    %c0_i32 = arith.constant 0 : i32
    %c0_i32_0 = arith.constant 0 : i32
    %c0_i32_1 = arith.constant 0 : i32
    return %c0_i32, %c0_i32_0 : i32, i32
  }
  func.func @transform_3(%arg0: i32, %arg1: i32) -> (i32, i32) {
    %c0_i32 = arith.constant 0 : i32
    %c0_i32_0 = arith.constant 0 : i32
    return %arg0, %c0_i32 : i32, i32
  }
}

module attributes {stable_mosaic.version = 11 : i64} {
  func.func @_linear_kernel(%arg0: i32, %arg1: i32, %arg2: memref<8x32xf32, #tpu.memory_space<vmem>>, %arg3: memref<32x32xf32, #tpu.memory_space<vmem>>, %arg4: memref<1x32xf32, #tpu.memory_space<vmem>>, %arg5: memref<8x32xf32, #tpu.memory_space<vmem>>, %arg6: memref<8x32xf32, #tpu.memory_space<vmem>>) attributes {dimension_semantics = [#tpu.dimension_semantics<parallel>, #tpu.dimension_semantics<arbitrary>], iteration_bounds = array<i64: 1, 1>, scalar_prefetch = 0 : i64, scratch_operands = 1 : i64, tpu.core_type = #tpu.core_type<tc>, window_params = [{transform_indices = @transform_0, window_bounds = array<i64: 8, 32>}, {transform_indices = @transform_1, window_bounds = array<i64: 32, 32>}, {pipeline_mode = #tpu.pipeline_mode<synchronous>, transform_indices = @transform_2, window_bounds = array<i64: 1, 32>}, {transform_indices = @transform_3, window_bounds = array<i64: 8, 32>}]} {
    %c0_i32 = arith.constant 0 : i32
    %0 = arith.cmpi eq, %arg1, %c0_i32 : i32
    %1 = arith.extui %0 : i1 to i32
    %c0_i32_0 = arith.constant 0 : i32
    %2 = arith.cmpi ne, %1, %c0_i32_0 : i32
    scf.if %2 {
      %cst_10 = arith.constant 0.000000e+00 : f32
      %12 = vector.broadcast %cst_10 : f32 to vector<8x32xf32>
      %c0_11 = arith.constant 0 : index
      %c0_12 = arith.constant 0 : index
      %13 = vector.load %arg6[%c0_11, %c0_12] : memref<8x32xf32, #tpu.memory_space<vmem>>, vector<8x32xf32>
      tpu.vector_store %arg6[%c0_11, %c0_12], %12 {strides = array<i32>} : memref<8x32xf32, #tpu.memory_space<vmem>>, vector<8x32xf32>,
    } else {
    }
    %c0 = arith.constant 0 : index
    %c0_1 = arith.constant 0 : index
    %3 = vector.load %arg2[%c0, %c0_1] : memref<8x32xf32, #tpu.memory_space<vmem>>, vector<8x32xf32>
    %c0_2 = arith.constant 0 : index
    %c0_3 = arith.constant 0 : index
    %4 = vector.load %arg3[%c0_2, %c0_3] : memref<32x32xf32, #tpu.memory_space<vmem>>, vector<32x32xf32>
    %c0_4 = arith.constant 0 : index
    %c0_5 = arith.constant 0 : index
    %5 = vector.load %arg6[%c0_4, %c0_5] : memref<8x32xf32, #tpu.memory_space<vmem>>, vector<8x32xf32>
    %cst = arith.constant dense<0.000000e+00> : vector<8x32xf32>
    %6 = tpu.matmul %3, %4, %cst {dimension_numbers = #tpu.dot_dimension_numbers<[1], [0], [0], [1], [0, 0, 1, 1], [], []>} : vector<8x32xf32>, vector<32x32xf32>, vector<8x32xf32> -> vector<8x32xf32>
    %7 = arith.addf %5, %6 : vector<8x32xf32>
    %c0_6 = arith.constant 0 : index
    %c0_7 = arith.constant 0 : index
    %8 = vector.load %arg6[%c0_6, %c0_7] : memref<8x32xf32, #tpu.memory_space<vmem>>, vector<8x32xf32>
    tpu.vector_store %arg6[%c0_6, %c0_7], %7 {strides = array<i32>} : memref<8x32xf32, #tpu.memory_space<vmem>>, vector<8x32xf32>,
    %c0_i32_8 = arith.constant 0 : i32
    %9 = arith.cmpi eq, %arg1, %c0_i32_8 : i32
    %10 = arith.extui %9 : i1 to i32
    %c0_i32_9 = arith.constant 0 : i32
    %11 = arith.cmpi ne, %10, %c0_i32_9 : i32
    scf.if %11 {
      %c0_10 = arith.constant 0 : index
      %c0_11 = arith.constant 0 : index
      %12 = vector.load %arg6[%c0_10, %c0_11] : memref<8x32xf32, #tpu.memory_space<vmem>>, vector<8x32xf32>
      %c0_12 = arith.constant 0 : index
      %c0_13 = arith.constant 0 : index
      %13 = vector.load %arg4[%c0_12, %c0_13] : memref<1x32xf32, #tpu.memory_space<vmem>>, vector<1x32xf32>
      %14 = vector.broadcast %13 : vector<1x32xf32> to vector<8x32xf32>
      %15 = arith.addf %12, %14 : vector<8x32xf32>
      %16 = math.tanh %15 : vector<8x32xf32>
      %c0_14 = arith.constant 0 : index
      %c0_15 = arith.constant 0 : index
      %17 = vector.load %arg5[%c0_14, %c0_15] : memref<8x32xf32, #tpu.memory_space<vmem>>, vector<8x32xf32>
      tpu.vector_store %arg5[%c0_14, %c0_15], %16 {strides = array<i32>} : memref<8x32xf32, #tpu.memory_space<vmem>>, vector<8x32xf32>,
    } else {
    }
    return
  }
  func.func @transform_0(%arg0: i32, %arg1: i32) -> (i32, i32) {
    %c0_i32 = arith.constant 0 : i32
    return %arg0, %arg1 : i32, i32
  }
  func.func @transform_1(%arg0: i32, %arg1: i32) -> (i32, i32) {
    %c0_i32 = arith.constant 0 : i32
    %c0_i32_0 = arith.constant 0 : i32
    return %arg1, %c0_i32 : i32, i32
  }
  func.func @transform_2(%arg0: i32, %arg1: i32) -> (i32, i32) {
    %c0_i32 = arith.constant 0 : i32
    %c0_i32_0 = arith.constant 0 : i32
    %c0_i32_1 = arith.constant 0 : i32
    return %c0_i32, %c0_i32_0 : i32, i32
  }
  func.func @transform_3(%arg0: i32, %arg1: i32) -> (i32, i32) {
    %c0_i32 = arith.constant 0 : i32
    %c0_i32_0 = arith.constant 0 : i32
    return %arg0, %c0_i32 : i32, i32
  }
}

module attributes {stable_mosaic.version = 11 : i64} {
  func.func @_linear_kernel(%arg0: i32, %arg1: i32, %arg2: memref<8x512xf32, #tpu.memory_space<vmem>>, %arg3: memref<512x32xf32, #tpu.memory_space<vmem>>, %arg4: memref<1x32xf32, #tpu.memory_space<vmem>>, %arg5: memref<8x32xf32, #tpu.memory_space<vmem>>, %arg6: memref<8x32xf32, #tpu.memory_space<vmem>>) attributes {dimension_semantics = [#tpu.dimension_semantics<parallel>, #tpu.dimension_semantics<arbitrary>], iteration_bounds = array<i64: 1, 3>, scalar_prefetch = 0 : i64, scratch_operands = 1 : i64, tpu.core_type = #tpu.core_type<tc>, window_params = [{transform_indices = @transform_0, window_bounds = array<i64: 8, 512>}, {transform_indices = @transform_1, window_bounds = array<i64: 512, 32>}, {pipeline_mode = #tpu.pipeline_mode<synchronous>, transform_indices = @transform_2, window_bounds = array<i64: 1, 32>}, {transform_indices = @transform_3, window_bounds = array<i64: 8, 32>}]} {
    %c0_i32 = arith.constant 0 : i32
    %0 = arith.cmpi eq, %arg1, %c0_i32 : i32
    %1 = arith.extui %0 : i1 to i32
    %c0_i32_0 = arith.constant 0 : i32
    %2 = arith.cmpi ne, %1, %c0_i32_0 : i32
    scf.if %2 {
      %cst_13 = arith.constant 0.000000e+00 : f32
      %28 = vector.broadcast %cst_13 : f32 to vector<8x32xf32>
      %c0_14 = arith.constant 0 : index
      %c0_15 = arith.constant 0 : index
      %29 = vector.load %arg6[%c0_14, %c0_15] : memref<8x32xf32, #tpu.memory_space<vmem>>, vector<8x32xf32>
      tpu.vector_store %arg6[%c0_14, %c0_15], %28 {strides = array<i32>} : memref<8x32xf32, #tpu.memory_space<vmem>>, vector<8x32xf32>,
    } else {
    }
    %c0 = arith.constant 0 : index
    %c0_1 = arith.constant 0 : index
    %3 = vector.load %arg2[%c0, %c0_1] : memref<8x512xf32, #tpu.memory_space<vmem>>, vector<8x512xf32>
    %c0_2 = arith.constant 0 : index
    %c0_3 = arith.constant 0 : index
    %4 = vector.load %arg3[%c0_2, %c0_3] : memref<512x32xf32, #tpu.memory_space<vmem>>, vector<512x32xf32>
    %c512_i32 = arith.constant 512 : i32
    %5 = arith.muli %arg1, %c512_i32 : i32
    %6 = tpu.iota {dimensions = array<i32: 1>} : vector<8x512xi32>
    %7 = vector.broadcast %5 : i32 to vector<8x512xi32>
    %8 = arith.addi %7, %6 : vector<8x512xi32>
    %c1032_i32 = arith.constant 1032 : i32
    %9 = vector.broadcast %c1032_i32 : i32 to vector<8x512xi32>
    %10 = arith.cmpi slt, %8, %9 : vector<8x512xi32>
    %cst = arith.constant 0.000000e+00 : f32
    %11 = vector.broadcast %cst : f32 to vector<8x512xf32>
    %12 = arith.select %10, %3, %11 : vector<8x512xi1>, vector<8x512xf32>
    %c512_i32_4 = arith.constant 512 : i32
    %13 = arith.muli %arg1, %c512_i32_4 : i32
    %14 = tpu.iota {dimensions = array<i32: 0>} : vector<512x32xi32>
    %15 = vector.broadcast %13 : i32 to vector<512x32xi32>
    %16 = arith.addi %15, %14 : vector<512x32xi32>
    %c1032_i32_5 = arith.constant 1032 : i32
    %17 = vector.broadcast %c1032_i32_5 : i32 to vector<512x32xi32>
    %18 = arith.cmpi slt, %16, %17 : vector<512x32xi32>
    %cst_6 = arith.constant 0.000000e+00 : f32
    %19 = vector.broadcast %cst_6 : f32 to vector<512x32xf32>
    %20 = arith.select %18, %4, %19 : vector<512x32xi1>, vector<512x32xf32>
    %c0_7 = arith.constant 0 : index
    %c0_8 = arith.constant 0 : index
    %21 = vector.load %arg6[%c0_7, %c0_8] : memref<8x32xf32, #tpu.memory_space<vmem>>, vector<8x32xf32>
    %cst_9 = arith.constant dense<0.000000e+00> : vector<8x32xf32>
    %22 = tpu.matmul %12, %20, %cst_9 {dimension_numbers = #tpu.dot_dimension_numbers<[1], [0], [0], [1], [0, 0, 1, 1], [], []>} : vector<8x512xf32>, vector<512x32xf32>, vector<8x32xf32> -> vector<8x32xf32>
    %23 = arith.addf %21, %22 : vector<8x32xf32>
    %c0_10 = arith.constant 0 : index
    %c0_11 = arith.constant 0 : index
    %24 = vector.load %arg6[%c0_10, %c0_11] : memref<8x32xf32, #tpu.memory_space<vmem>>, vector<8x32xf32>
    tpu.vector_store %arg6[%c0_10, %c0_11], %23 {strides = array<i32>} : memref<8x32xf32, #tpu.memory_space<vmem>>, vector<8x32xf32>,
    %c2_i32 = arith.constant 2 : i32
    %25 = arith.cmpi eq, %arg1, %c2_i32 : i32
    %26 = arith.extui %25 : i1 to i32
    %c0_i32_12 = arith.constant 0 : i32
    %27 = arith.cmpi ne, %26, %c0_i32_12 : i32
    scf.if %27 {
      %c0_13 = arith.constant 0 : index
      %c0_14 = arith.constant 0 : index
      %28 = vector.load %arg6[%c0_13, %c0_14] : memref<8x32xf32, #tpu.memory_space<vmem>>, vector<8x32xf32>
      %c0_15 = arith.constant 0 : index
      %c0_16 = arith.constant 0 : index
      %29 = vector.load %arg4[%c0_15, %c0_16] : memref<1x32xf32, #tpu.memory_space<vmem>>, vector<1x32xf32>
      %30 = vector.broadcast %29 : vector<1x32xf32> to vector<8x32xf32>
      %31 = arith.addf %28, %30 : vector<8x32xf32>
      %32 = math.tanh %31 : vector<8x32xf32>
      %c0_17 = arith.constant 0 : index
      %c0_18 = arith.constant 0 : index
      %33 = vector.load %arg5[%c0_17, %c0_18] : memref<8x32xf32, #tpu.memory_space<vmem>>, vector<8x32xf32>
      tpu.vector_store %arg5[%c0_17, %c0_18], %32 {strides = array<i32>} : memref<8x32xf32, #tpu.memory_space<vmem>>, vector<8x32xf32>,
    } else {
    }
    return
  }
  func.func @transform_0(%arg0: i32, %arg1: i32) -> (i32, i32) {
    %c0_i32 = arith.constant 0 : i32
    return %arg0, %arg1 : i32, i32
  }
  func.func @transform_1(%arg0: i32, %arg1: i32) -> (i32, i32) {
    %c0_i32 = arith.constant 0 : i32
    %c0_i32_0 = arith.constant 0 : i32
    return %arg1, %c0_i32 : i32, i32
  }
  func.func @transform_2(%arg0: i32, %arg1: i32) -> (i32, i32) {
    %c0_i32 = arith.constant 0 : i32
    %c0_i32_0 = arith.constant 0 : i32
    %c0_i32_1 = arith.constant 0 : i32
    return %c0_i32, %c0_i32_0 : i32, i32
  }
  func.func @transform_3(%arg0: i32, %arg1: i32) -> (i32, i32) {
    %c0_i32 = arith.constant 0 : i32
    %c0_i32_0 = arith.constant 0 : i32
    return %arg0, %c0_i32 : i32, i32
  }
}

module attributes {stable_mosaic.version = 11 : i64} {
  func.func @_linear_kernel(%arg0: i32, %arg1: i32, %arg2: memref<8x32xf32, #tpu.memory_space<vmem>>, %arg3: memref<32x16xf32, #tpu.memory_space<vmem>>, %arg4: memref<1x16xf32, #tpu.memory_space<vmem>>, %arg5: memref<8x16xf32, #tpu.memory_space<vmem>>, %arg6: memref<8x16xf32, #tpu.memory_space<vmem>>) attributes {dimension_semantics = [#tpu.dimension_semantics<parallel>, #tpu.dimension_semantics<arbitrary>], iteration_bounds = array<i64: 1, 1>, scalar_prefetch = 0 : i64, scratch_operands = 1 : i64, tpu.core_type = #tpu.core_type<tc>, window_params = [{transform_indices = @transform_0, window_bounds = array<i64: 8, 32>}, {transform_indices = @transform_1, window_bounds = array<i64: 32, 16>}, {pipeline_mode = #tpu.pipeline_mode<synchronous>, transform_indices = @transform_2, window_bounds = array<i64: 1, 16>}, {transform_indices = @transform_3, window_bounds = array<i64: 8, 16>}]} {
    %c0_i32 = arith.constant 0 : i32
    %0 = arith.cmpi eq, %arg1, %c0_i32 : i32
    %1 = arith.extui %0 : i1 to i32
    %c0_i32_0 = arith.constant 0 : i32
    %2 = arith.cmpi ne, %1, %c0_i32_0 : i32
    scf.if %2 {
      %cst_10 = arith.constant 0.000000e+00 : f32
      %12 = vector.broadcast %cst_10 : f32 to vector<8x16xf32>
      %c0_11 = arith.constant 0 : index
      %c0_12 = arith.constant 0 : index
      %13 = vector.load %arg6[%c0_11, %c0_12] : memref<8x16xf32, #tpu.memory_space<vmem>>, vector<8x16xf32>
      tpu.vector_store %arg6[%c0_11, %c0_12], %12 {strides = array<i32>} : memref<8x16xf32, #tpu.memory_space<vmem>>, vector<8x16xf32>,
    } else {
    }
    %c0 = arith.constant 0 : index
    %c0_1 = arith.constant 0 : index
    %3 = vector.load %arg2[%c0, %c0_1] : memref<8x32xf32, #tpu.memory_space<vmem>>, vector<8x32xf32>
    %c0_2 = arith.constant 0 : index
    %c0_3 = arith.constant 0 : index
    %4 = vector.load %arg3[%c0_2, %c0_3] : memref<32x16xf32, #tpu.memory_space<vmem>>, vector<32x16xf32>
    %c0_4 = arith.constant 0 : index
    %c0_5 = arith.constant 0 : index
    %5 = vector.load %arg6[%c0_4, %c0_5] : memref<8x16xf32, #tpu.memory_space<vmem>>, vector<8x16xf32>
    %cst = arith.constant dense<0.000000e+00> : vector<8x16xf32>
    %6 = tpu.matmul %3, %4, %cst {dimension_numbers = #tpu.dot_dimension_numbers<[1], [0], [0], [1], [0, 0, 1, 1], [], []>} : vector<8x32xf32>, vector<32x16xf32>, vector<8x16xf32> -> vector<8x16xf32>
    %7 = arith.addf %5, %6 : vector<8x16xf32>
    %c0_6 = arith.constant 0 : index
    %c0_7 = arith.constant 0 : index
    %8 = vector.load %arg6[%c0_6, %c0_7] : memref<8x16xf32, #tpu.memory_space<vmem>>, vector<8x16xf32>
    tpu.vector_store %arg6[%c0_6, %c0_7], %7 {strides = array<i32>} : memref<8x16xf32, #tpu.memory_space<vmem>>, vector<8x16xf32>,
    %c0_i32_8 = arith.constant 0 : i32
    %9 = arith.cmpi eq, %arg1, %c0_i32_8 : i32
    %10 = arith.extui %9 : i1 to i32
    %c0_i32_9 = arith.constant 0 : i32
    %11 = arith.cmpi ne, %10, %c0_i32_9 : i32
    scf.if %11 {
      %c0_10 = arith.constant 0 : index
      %c0_11 = arith.constant 0 : index
      %12 = vector.load %arg6[%c0_10, %c0_11] : memref<8x16xf32, #tpu.memory_space<vmem>>, vector<8x16xf32>
      %c0_12 = arith.constant 0 : index
      %c0_13 = arith.constant 0 : index
      %13 = vector.load %arg4[%c0_12, %c0_13] : memref<1x16xf32, #tpu.memory_space<vmem>>, vector<1x16xf32>
      %14 = vector.broadcast %13 : vector<1x16xf32> to vector<8x16xf32>
      %15 = arith.addf %12, %14 : vector<8x16xf32>
      %c0_14 = arith.constant 0 : index
      %c0_15 = arith.constant 0 : index
      %16 = vector.load %arg5[%c0_14, %c0_15] : memref<8x16xf32, #tpu.memory_space<vmem>>, vector<8x16xf32>
      tpu.vector_store %arg5[%c0_14, %c0_15], %15 {strides = array<i32>} : memref<8x16xf32, #tpu.memory_space<vmem>>, vector<8x16xf32>,
    } else {
    }
    return
  }
  func.func @transform_0(%arg0: i32, %arg1: i32) -> (i32, i32) {
    %c0_i32 = arith.constant 0 : i32
    return %arg0, %arg1 : i32, i32
  }
  func.func @transform_1(%arg0: i32, %arg1: i32) -> (i32, i32) {
    %c0_i32 = arith.constant 0 : i32
    %c0_i32_0 = arith.constant 0 : i32
    return %arg1, %c0_i32 : i32, i32
  }
  func.func @transform_2(%arg0: i32, %arg1: i32) -> (i32, i32) {
    %c0_i32 = arith.constant 0 : i32
    %c0_i32_0 = arith.constant 0 : i32
    %c0_i32_1 = arith.constant 0 : i32
    return %c0_i32, %c0_i32_0 : i32, i32
  }
  func.func @transform_3(%arg0: i32, %arg1: i32) -> (i32, i32) {
    %c0_i32 = arith.constant 0 : i32
    %c0_i32_0 = arith.constant 0 : i32
    return %arg0, %c0_i32 : i32, i32
  }
}

module attributes {stable_mosaic.version = 11 : i64} {
  func.func @_kl_kernel(%arg0: i32, %arg1: memref<8x8xf32, #tpu.memory_space<vmem>>, %arg2: memref<8x8xf32, #tpu.memory_space<vmem>>, %arg3: memref<8x8xf32, #tpu.memory_space<vmem>>, %arg4: memref<8x8xf32, #tpu.memory_space<vmem>>, %arg5: memref<8x1xf32, #tpu.memory_space<vmem>>) attributes {dimension_semantics = [#tpu.dimension_semantics<parallel>], iteration_bounds = array<i64: 1>, scalar_prefetch = 0 : i64, scratch_operands = 0 : i64, tpu.core_type = #tpu.core_type<tc>, window_params = [{transform_indices = @transform_0, window_bounds = array<i64: 8, 8>}, {transform_indices = @transform_1, window_bounds = array<i64: 8, 8>}, {transform_indices = @transform_2, window_bounds = array<i64: 8, 8>}, {transform_indices = @transform_3, window_bounds = array<i64: 8, 8>}, {transform_indices = @transform_4, window_bounds = array<i64: 8, 1>}]} {
    %c0 = arith.constant 0 : index
    %c0_0 = arith.constant 0 : index
    %0 = vector.load %arg1[%c0, %c0_0] : memref<8x8xf32, #tpu.memory_space<vmem>>, vector<8x8xf32>
    %c0_1 = arith.constant 0 : index
    %c0_2 = arith.constant 0 : index
    %1 = vector.load %arg2[%c0_1, %c0_2] : memref<8x8xf32, #tpu.memory_space<vmem>>, vector<8x8xf32>
    %c0_3 = arith.constant 0 : index
    %c0_4 = arith.constant 0 : index
    %2 = vector.load %arg3[%c0_3, %c0_4] : memref<8x8xf32, #tpu.memory_space<vmem>>, vector<8x8xf32>
    %c0_5 = arith.constant 0 : index
    %c0_6 = arith.constant 0 : index
    %3 = vector.load %arg4[%c0_5, %c0_6] : memref<8x8xf32, #tpu.memory_space<vmem>>, vector<8x8xf32>
    %4 = math.exp %1 : vector<8x8xf32>
    %5 = arith.subf %0, %2 : vector<8x8xf32>
    %6 = arith.mulf %5, %5 : vector<8x8xf32>
    %7 = arith.addf %4, %6 : vector<8x8xf32>
    %8 = math.exp %3 : vector<8x8xf32>
    %cst = arith.constant 9.99999997E-7 : f32
    %9 = vector.broadcast %cst : f32 to vector<8x8xf32>
    %10 = arith.addf %8, %9 : vector<8x8xf32>
    %11 = arith.divf %7, %10 : vector<8x8xf32>
    %cst_7 = arith.constant 1.000000e+00 : f32
    %12 = vector.broadcast %cst_7 : f32 to vector<8x8xf32>
    %13 = arith.subf %11, %12 : vector<8x8xf32>
    %14 = arith.addf %13, %3 : vector<8x8xf32>
    %15 = arith.subf %14, %1 : vector<8x8xf32>
    %cst_8 = arith.constant dense<0.000000e+00> : vector<8xf32>
    %16 = vector.multi_reduction <add>, %15, %cst_8 [1] : vector<8x8xf32> to vector<8xf32>
    %17 = vector.shape_cast %16 : vector<8xf32> to vector<8x1xf32>
    %cst_9 = arith.constant 5.000000e-01 : f32
    %18 = vector.broadcast %cst_9 : f32 to vector<8x1xf32>
    %19 = arith.mulf %18, %17 : vector<8x1xf32>
    %c0_10 = arith.constant 0 : index
    %c0_11 = arith.constant 0 : index
    %20 = vector.load %arg5[%c0_10, %c0_11] : memref<8x1xf32, #tpu.memory_space<vmem>>, vector<8x1xf32>
    tpu.vector_store %arg5[%c0_10, %c0_11], %19 {strides = array<i32>} : memref<8x1xf32, #tpu.memory_space<vmem>>, vector<8x1xf32>,
    return
  }
  func.func @transform_0(%arg0: i32) -> (i32, i32) {
    %c0_i32 = arith.constant 0 : i32
    %c0_i32_0 = arith.constant 0 : i32
    return %arg0, %c0_i32 : i32, i32
  }
  func.func @transform_1(%arg0: i32) -> (i32, i32) {
    %c0_i32 = arith.constant 0 : i32
    %c0_i32_0 = arith.constant 0 : i32
    return %arg0, %c0_i32 : i32, i32
  }
  func.func @transform_2(%arg0: i32) -> (i32, i32) {
    %c0_i32 = arith.constant 0 : i32
    %c0_i32_0 = arith.constant 0 : i32
    return %arg0, %c0_i32 : i32, i32
  }
  func.func @transform_3(%arg0: i32) -> (i32, i32) {
    %c0_i32 = arith.constant 0 : i32
    %c0_i32_0 = arith.constant 0 : i32
    return %arg0, %c0_i32 : i32, i32
  }
  func.func @transform_4(%arg0: i32) -> (i32, i32) {
    %c0_i32 = arith.constant 0 : i32
    %c0_i32_0 = arith.constant 0 : i32
    return %arg0, %c0_i32 : i32, i32
  }
}

module attributes {stable_mosaic.version = 11 : i64} {
  func.func @_beta_logits_kernel(%arg0: i32, %arg1: memref<8x32xf32, #tpu.memory_space<vmem>>, %arg2: memref<32x1024xf32, #tpu.memory_space<vmem>>, %arg3: memref<8x1024xf32, #tpu.memory_space<vmem>>, %arg4: memref<8x1xf32, #tpu.memory_space<vmem>>, %arg5: memref<8x1xf32, #tpu.memory_space<vmem>>, %arg6: memref<8x1xf32, #tpu.memory_space<vmem>>) attributes {dimension_semantics = [#tpu.dimension_semantics<arbitrary>], iteration_bounds = array<i64: 1>, scalar_prefetch = 0 : i64, scratch_operands = 2 : i64, tpu.core_type = #tpu.core_type<tc>, window_params = [{pipeline_mode = #tpu.pipeline_mode<synchronous>, transform_indices = @transform_0, window_bounds = array<i64: 8, 32>}, {transform_indices = @transform_1, window_bounds = array<i64: 32, 1024>}, {transform_indices = @transform_2, window_bounds = array<i64: 8, 1024>}, {pipeline_mode = #tpu.pipeline_mode<synchronous>, transform_indices = @transform_3, window_bounds = array<i64: 8, 1>}]} {
    %c0_i32 = arith.constant 0 : i32
    %0 = arith.cmpi eq, %arg0, %c0_i32 : i32
    %1 = arith.extui %0 : i1 to i32
    %c0_i32_0 = arith.constant 0 : i32
    %2 = arith.cmpi ne, %1, %c0_i32_0 : i32
    scf.if %2 {
      %cst_23 = arith.constant 0xFF800000 : f32
      %37 = vector.broadcast %cst_23 : f32 to vector<8x1xf32>
      %c0_24 = arith.constant 0 : index
      %c0_25 = arith.constant 0 : index
      %38 = vector.load %arg5[%c0_24, %c0_25] : memref<8x1xf32, #tpu.memory_space<vmem>>, vector<8x1xf32>
      tpu.vector_store %arg5[%c0_24, %c0_25], %37 {strides = array<i32>} : memref<8x1xf32, #tpu.memory_space<vmem>>, vector<8x1xf32>,
      %cst_26 = arith.constant 0.000000e+00 : f32
      %39 = vector.broadcast %cst_26 : f32 to vector<8x1xf32>
      %c0_27 = arith.constant 0 : index
      %c0_28 = arith.constant 0 : index
      %40 = vector.load %arg6[%c0_27, %c0_28] : memref<8x1xf32, #tpu.memory_space<vmem>>, vector<8x1xf32>
      tpu.vector_store %arg6[%c0_27, %c0_28], %39 {strides = array<i32>} : memref<8x1xf32, #tpu.memory_space<vmem>>, vector<8x1xf32>,
    } else {
    }
    %c0 = arith.constant 0 : index
    %c0_1 = arith.constant 0 : index
    %3 = vector.load %arg1[%c0, %c0_1] : memref<8x32xf32, #tpu.memory_space<vmem>>, vector<8x32xf32>
    %c0_2 = arith.constant 0 : index
    %c0_3 = arith.constant 0 : index
    %4 = vector.load %arg2[%c0_2, %c0_3] : memref<32x1024xf32, #tpu.memory_space<vmem>>, vector<32x1024xf32>
    %cst = arith.constant dense<0.000000e+00> : vector<8x1024xf32>
    %5 = tpu.matmul %3, %4, %cst {dimension_numbers = #tpu.dot_dimension_numbers<[1], [0], [0], [1], [0, 0, 1, 1], [], []>} : vector<8x32xf32>, vector<32x1024xf32>, vector<8x1024xf32> -> vector<8x1024xf32>
    %c1024_i32 = arith.constant 1024 : i32
    %6 = arith.muli %arg0, %c1024_i32 : i32
    %7 = tpu.iota {dimensions = array<i32: 1>} : vector<8x1024xi32>
    %8 = vector.broadcast %6 : i32 to vector<8x1024xi32>
    %9 = arith.addi %8, %7 : vector<8x1024xi32>
    %c1024_i32_4 = arith.constant 1024 : i32
    %10 = vector.broadcast %c1024_i32_4 : i32 to vector<8x1024xi32>
    %11 = arith.cmpi slt, %9, %10 : vector<8x1024xi32>
    %cst_5 = arith.constant 0xFF800000 : f32
    %12 = vector.broadcast %cst_5 : f32 to vector<8x1024xf32>
    %13 = arith.select %11, %5, %12 : vector<8x1024xi1>, vector<8x1024xf32>
    %c0_6 = arith.constant 0 : index
    %c0_7 = arith.constant 0 : index
    %14 = vector.load %arg5[%c0_6, %c0_7] : memref<8x1xf32, #tpu.memory_space<vmem>>, vector<8x1xf32>
    %cst_8 = arith.constant dense<0xFF800000> : vector<8xf32>
    %15 = vector.multi_reduction <maximumf>, %13, %cst_8 [1] : vector<8x1024xf32> to vector<8xf32>
    %16 = vector.shape_cast %15 : vector<8xf32> to vector<8x1xf32>
    %17 = arith.maximumf %14, %16 : vector<8x1xf32>
    %c0_9 = arith.constant 0 : index
    %c0_10 = arith.constant 0 : index
    %18 = vector.load %arg6[%c0_9, %c0_10] : memref<8x1xf32, #tpu.memory_space<vmem>>, vector<8x1xf32>
    %c0_11 = arith.constant 0 : index
    %c0_12 = arith.constant 0 : index
    %19 = vector.load %arg5[%c0_11, %c0_12] : memref<8x1xf32, #tpu.memory_space<vmem>>, vector<8x1xf32>
    %20 = arith.subf %19, %17 : vector<8x1xf32>
    %21 = math.exp %20 : vector<8x1xf32>
    %22 = arith.mulf %18, %21 : vector<8x1xf32>
    %23 = vector.broadcast %17 : vector<8x1xf32> to vector<8x1024xf32>
    %24 = arith.subf %13, %23 : vector<8x1024xf32>
    %25 = math.exp %24 : vector<8x1024xf32>
    %cst_13 = arith.constant dense<0.000000e+00> : vector<8xf32>
    %26 = vector.multi_reduction <add>, %25, %cst_13 [1] : vector<8x1024xf32> to vector<8xf32>
    %27 = vector.shape_cast %26 : vector<8xf32> to vector<8x1xf32>
    %28 = arith.addf %22, %27 : vector<8x1xf32>
    %c0_14 = arith.constant 0 : index
    %c0_15 = arith.constant 0 : index
    %29 = vector.load %arg6[%c0_14, %c0_15] : memref<8x1xf32, #tpu.memory_space<vmem>>, vector<8x1xf32>
    tpu.vector_store %arg6[%c0_14, %c0_15], %28 {strides = array<i32>} : memref<8x1xf32, #tpu.memory_space<vmem>>, vector<8x1xf32>,
    %c0_16 = arith.constant 0 : index
    %c0_17 = arith.constant 0 : index
    %30 = vector.load %arg5[%c0_16, %c0_17] : memref<8x1xf32, #tpu.memory_space<vmem>>, vector<8x1xf32>
    tpu.vector_store %arg5[%c0_16, %c0_17], %17 {strides = array<i32>} : memref<8x1xf32, #tpu.memory_space<vmem>>, vector<8x1xf32>,
    %cst_18 = arith.constant 0.000000e+00 : f32
    %31 = vector.broadcast %cst_18 : f32 to vector<8x1024xf32>
    %32 = arith.select %11, %5, %31 : vector<8x1024xi1>, vector<8x1024xf32>
    %c0_19 = arith.constant 0 : index
    %c0_20 = arith.constant 0 : index
    %33 = vector.load %arg3[%c0_19, %c0_20] : memref<8x1024xf32, #tpu.memory_space<vmem>>, vector<8x1024xf32>
    tpu.vector_store %arg3[%c0_19, %c0_20], %32 {strides = array<i32>} : memref<8x1024xf32, #tpu.memory_space<vmem>>, vector<8x1024xf32>,
    %c0_i32_21 = arith.constant 0 : i32
    %34 = arith.cmpi eq, %arg0, %c0_i32_21 : i32
    %35 = arith.extui %34 : i1 to i32
    %c0_i32_22 = arith.constant 0 : i32
    %36 = arith.cmpi ne, %35, %c0_i32_22 : i32
    scf.if %36 {
      %c0_23 = arith.constant 0 : index
      %c0_24 = arith.constant 0 : index
      %37 = vector.load %arg5[%c0_23, %c0_24] : memref<8x1xf32, #tpu.memory_space<vmem>>, vector<8x1xf32>
      %c0_25 = arith.constant 0 : index
      %c0_26 = arith.constant 0 : index
      %38 = vector.load %arg6[%c0_25, %c0_26] : memref<8x1xf32, #tpu.memory_space<vmem>>, vector<8x1xf32>
      %39 = math.log %38 : vector<8x1xf32>
      %40 = arith.addf %37, %39 : vector<8x1xf32>
      %c0_27 = arith.constant 0 : index
      %c0_28 = arith.constant 0 : index
      %41 = vector.load %arg4[%c0_27, %c0_28] : memref<8x1xf32, #tpu.memory_space<vmem>>, vector<8x1xf32>
      tpu.vector_store %arg4[%c0_27, %c0_28], %40 {strides = array<i32>} : memref<8x1xf32, #tpu.memory_space<vmem>>, vector<8x1xf32>,
    } else {
    }
    return
  }
  func.func @transform_0(%arg0: i32) -> (i32, i32) {
    %c0_i32 = arith.constant 0 : i32
    %c0_i32_0 = arith.constant 0 : i32
    %c0_i32_1 = arith.constant 0 : i32
    return %c0_i32, %c0_i32_0 : i32, i32
  }
  func.func @transform_1(%arg0: i32) -> (i32, i32) {
    %c0_i32 = arith.constant 0 : i32
    %c0_i32_0 = arith.constant 0 : i32
    return %c0_i32, %arg0 : i32, i32
  }
  func.func @transform_2(%arg0: i32) -> (i32, i32) {
    %c0_i32 = arith.constant 0 : i32
    %c0_i32_0 = arith.constant 0 : i32
    return %c0_i32, %arg0 : i32, i32
  }
  func.func @transform_3(%arg0: i32) -> (i32, i32) {
    %c0_i32 = arith.constant 0 : i32
    %c0_i32_0 = arith.constant 0 : i32
    %c0_i32_1 = arith.constant 0 : i32
    return %c0_i32, %c0_i32_0 : i32, i32
  }
}

module attributes {stable_mosaic.version = 11 : i64} {
  func.func @_beta_norm_kernel(%arg0: i32, %arg1: memref<8x1024xf32, #tpu.memory_space<vmem>>, %arg2: memref<8x1xf32, #tpu.memory_space<vmem>>, %arg3: memref<8x1024xf32, #tpu.memory_space<vmem>>) attributes {dimension_semantics = [#tpu.dimension_semantics<parallel>], iteration_bounds = array<i64: 1>, scalar_prefetch = 0 : i64, scratch_operands = 0 : i64, tpu.core_type = #tpu.core_type<tc>, window_params = [{transform_indices = @transform_0, window_bounds = array<i64: 8, 1024>}, {pipeline_mode = #tpu.pipeline_mode<synchronous>, transform_indices = @transform_1, window_bounds = array<i64: 8, 1>}, {transform_indices = @transform_2, window_bounds = array<i64: 8, 1024>}]} {
    %c0 = arith.constant 0 : index
    %c0_0 = arith.constant 0 : index
    %0 = vector.load %arg1[%c0, %c0_0] : memref<8x1024xf32, #tpu.memory_space<vmem>>, vector<8x1024xf32>
    %c0_1 = arith.constant 0 : index
    %c0_2 = arith.constant 0 : index
    %1 = vector.load %arg2[%c0_1, %c0_2] : memref<8x1xf32, #tpu.memory_space<vmem>>, vector<8x1xf32>
    %2 = vector.broadcast %1 : vector<8x1xf32> to vector<8x1024xf32>
    %3 = arith.subf %0, %2 : vector<8x1024xf32>
    %4 = math.exp %3 : vector<8x1024xf32>
    %c0_3 = arith.constant 0 : index
    %c0_4 = arith.constant 0 : index
    %5 = vector.load %arg3[%c0_3, %c0_4] : memref<8x1024xf32, #tpu.memory_space<vmem>>, vector<8x1024xf32>
    tpu.vector_store %arg3[%c0_3, %c0_4], %4 {strides = array<i32>} : memref<8x1024xf32, #tpu.memory_space<vmem>>, vector<8x1024xf32>,
    return
  }
  func.func @transform_0(%arg0: i32) -> (i32, i32) {
    %c0_i32 = arith.constant 0 : i32
    %c0_i32_0 = arith.constant 0 : i32
    return %c0_i32, %arg0 : i32, i32
  }
  func.func @transform_1(%arg0: i32) -> (i32, i32) {
    %c0_i32 = arith.constant 0 : i32
    %c0_i32_0 = arith.constant 0 : i32
    %c0_i32_1 = arith.constant 0 : i32
    return %c0_i32, %c0_i32_0 : i32, i32
  }
  func.func @transform_2(%arg0: i32) -> (i32, i32) {
    %c0_i32 = arith.constant 0 : i32
    %c0_i32_0 = arith.constant 0 : i32
    return %c0_i32, %arg0 : i32, i32
  }
}

module attributes {stable_mosaic.version = 11 : i64} {
  func.func @_nll_kernel(%arg0: i32, %arg1: i32, %arg2: memref<8x8xf32, #tpu.memory_space<vmem>>, %arg3: memref<8x1024xf32, #tpu.memory_space<vmem>>, %arg4: memref<8x1024xbf16, #tpu.memory_space<vmem>>, %arg5: memref<8x1xf32, #tpu.memory_space<vmem>>, %arg6: memref<8x1xf32, #tpu.memory_space<vmem>>) attributes {dimension_semantics = [#tpu.dimension_semantics<parallel>, #tpu.dimension_semantics<arbitrary>], iteration_bounds = array<i64: 1, 1>, scalar_prefetch = 0 : i64, scratch_operands = 1 : i64, tpu.core_type = #tpu.core_type<tc>, window_params = [{transform_indices = @transform_0, window_bounds = array<i64: 8, 8>}, {transform_indices = @transform_1, window_bounds = array<i64: 8, 1024>}, {transform_indices = @transform_2, window_bounds = array<i64: 8, 1024>}, {transform_indices = @transform_3, window_bounds = array<i64: 8, 1>}]} {
    %c0_i32 = arith.constant 0 : i32
    %0 = arith.cmpi eq, %arg1, %c0_i32 : i32
    %1 = arith.extui %0 : i1 to i32
    %c0_i32_0 = arith.constant 0 : i32
    %2 = arith.cmpi ne, %1, %c0_i32_0 : i32
    scf.if %2 {
      %cst_15 = arith.constant 0.000000e+00 : f32
      %26 = vector.broadcast %cst_15 : f32 to vector<8x1xf32>
      %c0_16 = arith.constant 0 : index
      %c0_17 = arith.constant 0 : index
      %27 = vector.load %arg6[%c0_16, %c0_17] : memref<8x1xf32, #tpu.memory_space<vmem>>, vector<8x1xf32>
      tpu.vector_store %arg6[%c0_16, %c0_17], %26 {strides = array<i32>} : memref<8x1xf32, #tpu.memory_space<vmem>>, vector<8x1xf32>,
    } else {
    }
    %c0 = arith.constant 0 : index
    %c0_1 = arith.constant 0 : index
    %3 = vector.load %arg2[%c0, %c0_1] : memref<8x8xf32, #tpu.memory_space<vmem>>, vector<8x8xf32>
    %c0_2 = arith.constant 0 : index
    %c0_3 = arith.constant 0 : index
    %4 = vector.load %arg3[%c0_2, %c0_3] : memref<8x1024xf32, #tpu.memory_space<vmem>>, vector<8x1024xf32>
    %cst = arith.constant dense<0.000000e+00> : vector<8x1024xf32>
    %5 = tpu.matmul %3, %4, %cst {dimension_numbers = #tpu.dot_dimension_numbers<[1], [0], [0], [1], [0, 0, 1, 1], [], []>} : vector<8x8xf32>, vector<8x1024xf32>, vector<8x1024xf32> -> vector<8x1024xf32>
    %c1024_i32 = arith.constant 1024 : i32
    %6 = arith.muli %arg1, %c1024_i32 : i32
    %7 = tpu.iota {dimensions = array<i32: 1>} : vector<8x1024xi32>
    %8 = vector.broadcast %6 : i32 to vector<8x1024xi32>
    %9 = arith.addi %8, %7 : vector<8x1024xi32>
    %c1024_i32_4 = arith.constant 1024 : i32
    %10 = vector.broadcast %c1024_i32_4 : i32 to vector<8x1024xi32>
    %11 = arith.cmpi slt, %9, %10 : vector<8x1024xi32>
    %12 = math.log %5 : vector<8x1024xf32>
    %c0_5 = arith.constant 0 : index
    %c0_6 = arith.constant 0 : index
    %13 = vector.load %arg4[%c0_5, %c0_6] : memref<8x1024xbf16, #tpu.memory_space<vmem>>, vector<8x1024xbf16>
    %14 = arith.extf %13 : vector<8x1024xbf16> to vector<8x1024xf32>
    %15 = arith.mulf %12, %14 : vector<8x1024xf32>
    %cst_7 = arith.constant 0.000000e+00 : f32
    %16 = vector.broadcast %cst_7 : f32 to vector<8x1024xf32>
    %17 = arith.select %11, %15, %16 : vector<8x1024xi1>, vector<8x1024xf32>
    %c0_8 = arith.constant 0 : index
    %c0_9 = arith.constant 0 : index
    %18 = vector.load %arg6[%c0_8, %c0_9] : memref<8x1xf32, #tpu.memory_space<vmem>>, vector<8x1xf32>
    %cst_10 = arith.constant dense<0.000000e+00> : vector<8xf32>
    %19 = vector.multi_reduction <add>, %17, %cst_10 [1] : vector<8x1024xf32> to vector<8xf32>
    %20 = vector.shape_cast %19 : vector<8xf32> to vector<8x1xf32>
    %21 = arith.subf %18, %20 : vector<8x1xf32>
    %c0_11 = arith.constant 0 : index
    %c0_12 = arith.constant 0 : index
    %22 = vector.load %arg6[%c0_11, %c0_12] : memref<8x1xf32, #tpu.memory_space<vmem>>, vector<8x1xf32>
    tpu.vector_store %arg6[%c0_11, %c0_12], %21 {strides = array<i32>} : memref<8x1xf32, #tpu.memory_space<vmem>>, vector<8x1xf32>,
    %c0_i32_13 = arith.constant 0 : i32
    %23 = arith.cmpi eq, %arg1, %c0_i32_13 : i32
    %24 = arith.extui %23 : i1 to i32
    %c0_i32_14 = arith.constant 0 : i32
    %25 = arith.cmpi ne, %24, %c0_i32_14 : i32
    scf.if %25 {
      %c0_15 = arith.constant 0 : index
      %c0_16 = arith.constant 0 : index
      %26 = vector.load %arg6[%c0_15, %c0_16] : memref<8x1xf32, #tpu.memory_space<vmem>>, vector<8x1xf32>
      %c0_17 = arith.constant 0 : index
      %c0_18 = arith.constant 0 : index
      %27 = vector.load %arg5[%c0_17, %c0_18] : memref<8x1xf32, #tpu.memory_space<vmem>>, vector<8x1xf32>
      tpu.vector_store %arg5[%c0_17, %c0_18], %26 {strides = array<i32>} : memref<8x1xf32, #tpu.memory_space<vmem>>, vector<8x1xf32>,
    } else {
    }
    return
  }
  func.func @transform_0(%arg0: i32, %arg1: i32) -> (i32, i32) {
    %c0_i32 = arith.constant 0 : i32
    %c0_i32_0 = arith.constant 0 : i32
    return %arg0, %c0_i32 : i32, i32
  }
  func.func @transform_1(%arg0: i32, %arg1: i32) -> (i32, i32) {
    %c0_i32 = arith.constant 0 : i32
    %c0_i32_0 = arith.constant 0 : i32
    return %c0_i32, %arg1 : i32, i32
  }
  func.func @transform_2(%arg0: i32, %arg1: i32) -> (i32, i32) {
    %c0_i32 = arith.constant 0 : i32
    return %arg0, %arg1 : i32, i32
  }
  func.func @transform_3(%arg0: i32, %arg1: i32) -> (i32, i32) {
    %c0_i32 = arith.constant 0 : i32
    %c0_i32_0 = arith.constant 0 : i32
    return %arg0, %c0_i32 : i32, i32
  }
}

module attributes {stable_mosaic.version = 11 : i64} {
  func.func @_kl_kernel(%arg0: i32, %arg1: memref<8x32xf32, #tpu.memory_space<vmem>>, %arg2: memref<8x32xf32, #tpu.memory_space<vmem>>, %arg3: memref<8x32xf32, #tpu.memory_space<vmem>>, %arg4: memref<8x32xf32, #tpu.memory_space<vmem>>, %arg5: memref<8x1xf32, #tpu.memory_space<vmem>>) attributes {dimension_semantics = [#tpu.dimension_semantics<parallel>], iteration_bounds = array<i64: 1>, scalar_prefetch = 0 : i64, scratch_operands = 0 : i64, tpu.core_type = #tpu.core_type<tc>, window_params = [{transform_indices = @transform_0, window_bounds = array<i64: 8, 32>}, {transform_indices = @transform_1, window_bounds = array<i64: 8, 32>}, {transform_indices = @transform_2, window_bounds = array<i64: 8, 32>}, {transform_indices = @transform_3, window_bounds = array<i64: 8, 32>}, {transform_indices = @transform_4, window_bounds = array<i64: 8, 1>}]} {
    %c0 = arith.constant 0 : index
    %c0_0 = arith.constant 0 : index
    %0 = vector.load %arg1[%c0, %c0_0] : memref<8x32xf32, #tpu.memory_space<vmem>>, vector<8x32xf32>
    %c0_1 = arith.constant 0 : index
    %c0_2 = arith.constant 0 : index
    %1 = vector.load %arg2[%c0_1, %c0_2] : memref<8x32xf32, #tpu.memory_space<vmem>>, vector<8x32xf32>
    %c0_3 = arith.constant 0 : index
    %c0_4 = arith.constant 0 : index
    %2 = vector.load %arg3[%c0_3, %c0_4] : memref<8x32xf32, #tpu.memory_space<vmem>>, vector<8x32xf32>
    %c0_5 = arith.constant 0 : index
    %c0_6 = arith.constant 0 : index
    %3 = vector.load %arg4[%c0_5, %c0_6] : memref<8x32xf32, #tpu.memory_space<vmem>>, vector<8x32xf32>
    %4 = math.exp %1 : vector<8x32xf32>
    %5 = arith.subf %0, %2 : vector<8x32xf32>
    %6 = arith.mulf %5, %5 : vector<8x32xf32>
    %7 = arith.addf %4, %6 : vector<8x32xf32>
    %8 = math.exp %3 : vector<8x32xf32>
    %cst = arith.constant 9.99999997E-7 : f32
    %9 = vector.broadcast %cst : f32 to vector<8x32xf32>
    %10 = arith.addf %8, %9 : vector<8x32xf32>
    %11 = arith.divf %7, %10 : vector<8x32xf32>
    %cst_7 = arith.constant 1.000000e+00 : f32
    %12 = vector.broadcast %cst_7 : f32 to vector<8x32xf32>
    %13 = arith.subf %11, %12 : vector<8x32xf32>
    %14 = arith.addf %13, %3 : vector<8x32xf32>
    %15 = arith.subf %14, %1 : vector<8x32xf32>
    %cst_8 = arith.constant dense<0.000000e+00> : vector<8xf32>
    %16 = vector.multi_reduction <add>, %15, %cst_8 [1] : vector<8x32xf32> to vector<8xf32>
    %17 = vector.shape_cast %16 : vector<8xf32> to vector<8x1xf32>
    %cst_9 = arith.constant 5.000000e-01 : f32
    %18 = vector.broadcast %cst_9 : f32 to vector<8x1xf32>
    %19 = arith.mulf %18, %17 : vector<8x1xf32>
    %c0_10 = arith.constant 0 : index
    %c0_11 = arith.constant 0 : index
    %20 = vector.load %arg5[%c0_10, %c0_11] : memref<8x1xf32, #tpu.memory_space<vmem>>, vector<8x1xf32>
    tpu.vector_store %arg5[%c0_10, %c0_11], %19 {strides = array<i32>} : memref<8x1xf32, #tpu.memory_space<vmem>>, vector<8x1xf32>,
    return
  }
  func.func @transform_0(%arg0: i32) -> (i32, i32) {
    %c0_i32 = arith.constant 0 : i32
    %c0_i32_0 = arith.constant 0 : i32
    return %arg0, %c0_i32 : i32, i32
  }
  func.func @transform_1(%arg0: i32) -> (i32, i32) {
    %c0_i32 = arith.constant 0 : i32
    %c0_i32_0 = arith.constant 0 : i32
    return %arg0, %c0_i32 : i32, i32
  }
  func.func @transform_2(%arg0: i32) -> (i32, i32) {
    %c0_i32 = arith.constant 0 : i32
    %c0_i32_0 = arith.constant 0 : i32
    return %arg0, %c0_i32 : i32, i32
  }
  func.func @transform_3(%arg0: i32) -> (i32, i32) {
    %c0_i32 = arith.constant 0 : i32
    %c0_i32_0 = arith.constant 0 : i32
    return %arg0, %c0_i32 : i32, i32
  }
  func.func @transform_4(%arg0: i32) -> (i32, i32) {
    %c0_i32 = arith.constant 0 : i32
    %c0_i32_0 = arith.constant 0 : i32
    return %arg0, %c0_i32 : i32, i32
  }
}

</mosaic_0001>

<bundles_post_ra>
// kernel: custom-call.5
= control target key start
LH: loop header
LB: loop body
LE: loop exit
PB: predicated region body
PF: predicated region fallthrough
CT: control target
= control target key end

     0   :  { %s6_s0 = inlined_call_operand.vmem [shape: bf16[4,2,32], index: 0, kind: output, shape index: {}]  }

// kernel: custom-call.3
= control target key start
LH: loop header
LB: loop body
LE: loop exit
PB: predicated region body
PF: predicated region fallthrough
CT: control target
= control target key end

     0   :  { %s6_s0 = inlined_call_operand.vmem [shape: f32[2,32], index: 0, kind: output, shape index: {}]  }

// kernel: custom-call.2
= control target key start
LH: loop header
LB: loop body
LE: loop exit
PB: predicated region body
PF: predicated region fallthrough
CT: control target
= control target key end

     0   :  { %s6_s0 = inlined_call_operand.vmem [shape: bf16[2,32], index: 0, kind: output, shape index: {}]  }

// kernel: custom-call.4
= control target key start
LH: loop header
LB: loop body
LE: loop exit
PB: predicated region body
PF: predicated region fallthrough
CT: control target
= control target key end

     0   :  { %s6_s0 = inlined_call_operand.vmem [shape: f32[3,2,8], index: 0, kind: output, shape index: {}]  }

// kernel: fwd_pallas.10
= control target key start
LH: loop header
LB: loop body
LE: loop exit
PB: predicated region body
PF: predicated region fallthrough
CT: control target
= control target key end

     0   :  { %s746_s12 = smov 0   ;;  %s748_s13 = smov 0   ;;  %s863_s0 = inlined_call_operand.vmem [shape: f32[8,1024], index: 0, kind: input, shape index: {}]   ;;  %s864_s1 = inlined_call_operand.vmem [shape: f32[1024,32], index: 1, kind: input, shape index: {}]   ;;  %s865_s2 = inlined_call_operand.vmem [shape: f32[1,32], index: 2, kind: input, shape index: {}]   ;;  %s866_s3 = inlined_call_operand.vmem [shape: f32[8,32], index: 3, kind: output, shape index: {}]  }
   0x1   :  { %s750_s14 = smov 0  }
   0x2 LB: > { %s22_s15 = sadd.s32 1, %s719_s13  ;;  %p531_p0 = scmp.ge.s32.totalorder %s723_s14, 1  ;;  %s723_s14 = sphi %s750_s14, %s13_s14   ;;  %s719_s13 = sphi %s748_s13, %s868_s13   ;;  %s715_s12 = sphi %s746_s12, %s867_s12  }
   0x3   : > { %p23_p1 = scmp.ge.s32.totalorder %s22_s15, 2  ;;  %p167_p2 = scmp.lt.s32.totalorder %s723_s14, 3 }
   0x5   : > { %s870_s15 = smov (%p23_p1, %s22_s15), 0  ;;  %p168_p3 = pnand %p531_p0, %p167_p2 }
   0x6   : > { %s532_s16 = sshll.u32 (!%p168_p3), %s715_s12, 2  ;;  %s534_s17 = sshll.u32 (!%p168_p3), %s715_s12, 6 }
   0x7   : > { %171 = sbr.rel (%p168_p3) target bundleno = 291 (0x123), region = 32  ;;  %p202_p4 = scmp.lt.s32.totalorder (!%p168_p3), %s532_s16, 7 }
   0x8   : > { %p210_p5 = scmp.lt.s32.totalorder (!%p168_p3), %s534_s17, 127  ;;  %p536_p6 = scmp.ne.s32.totalorder (!%p168_p3), %s715_s12, 0 }
   0xe   : > { %s872_s16 = smov (!%p202_p4, %s532_s16), 7  ;;  %s874_s17 = smov (!%p210_p5, %s534_s17), 127 }
   0xf   : > { %s533_s18 = sshll.u32 %s872_s16, 3  ;;  %s535_s22 = sshll.u32 %s874_s17, 3  ;;  %vm223_vm0 = vcmask (!%p536_p6), 261120   ;;  %v725_v0 = vmov (!%p536_p6), 0.0  }
  0x10   : > { %s771_s21 = scalar_lea.vmem %s863_s0, %s533_s18  ;;  %s776_s25 = scalar_lea.vmem %s864_s1, %s535_s22  ;;  %224 = vst.msk [vmem:[#allocation2] sm:$0xff] (!%p536_p6), %vm223_vm0, %v725_v0 }
  0x11   : > { %222 = sbr.rel (%p536_p6) target bundleno = 24 (0x18), region = 36 }
  0x18 PF: > { %v245_v1 = vld [vmem:[%s776_s25 + $0x80] sm:$0xff]  ;;  %v246_v2 = vld [vmem:[%s776_s25 + $0x88] sm:$0xff]  ;;  %v247_v12 = vld [vmem:[%s776_s25 + $0x90] sm:$0xff]  ;;  %vm435_vm1 = vcmask 261120   ;;  %p537_p7 = scmp.ne.s32.totalorder %s715_s12, 1 }
  0x19   : > { %v277_v3 = vld [vmem:[%s776_s25 + $0x180] sm:$0xff]  ;;  %v612_v4 = vpack.c.bf16 %v246_v2, %v245_v1  ;;  %v278_v5 = vld [vmem:[%s776_s25 + $0x188] sm:$0xff]  ;;  %v248_v14 = vld [vmem:[%s776_s25 + $0x98] sm:$0xff] }
  0x1a   : > { %v229_v6 = vld [vmem:[%s776_s25] sm:$0xff]  ;;  %v230_v7 = vld [vmem:[%s776_s25 + $0x8] sm:$0xff]  ;;  %v644_v8 = vpack.c.bf16 %v278_v5, %v277_v3  ;;  %v279_v15 = vld [vmem:[%s776_s25 + $0x190] sm:$0xff]  ;;  %v616_v17 = vpack.c.bf16 %v248_v14, %v247_v12 }
  0x1b   : > { %v614_v9 = vpack.c.bf16 %v230_v7, %v229_v6  ;;  %v261_v10 = vld [vmem:[%s776_s25 + $0x100] sm:$0xff]  ;;  %v262_v11 = vld [vmem:[%s776_s25 + $0x108] sm:$0xff]  ;;  %613 = vmatprep.subr.bf16.mxu0 %v612_v4  ;;  %v280_v16 = vld [vmem:[%s776_s25 + $0x198] sm:$0xff] }
  0x1c   : > { %v646_v13 = vpack.c.bf16 %v262_v11, %v261_v10  ;;  %645 = vmatprep.subr.bf16.mxu1 %v644_v8  ;;  %v648_v18 = vpack.c.bf16 %v280_v16, %v279_v15  ;;  %v231_v19 = vld [vmem:[%s776_s25 + $0x10] sm:$0xff]  ;;  %v232_v20 = vld [vmem:[%s776_s25 + $0x18] sm:$0xff]  ;;  %v249_v24 = vld [vmem:[%s776_s25 + $0xa0] sm:$0xff] }
  0x1d   : > { %615 = vmatpush3.bf16.msra.mxu0 %v614_v9  ;;  %v263_v21 = vld [vmem:[%s776_s25 + $0x110] sm:$0xff]  ;;  %v618_v22 = vpack.c.bf16 %v232_v20, %v231_v19  ;;  %v264_v23 = vld [vmem:[%s776_s25 + $0x118] sm:$0xff]  ;;  %v250_v25 = vld [vmem:[%s776_s25 + $0xa8] sm:$0xff] }
  0x1e   : > { %647 = vmatpush3.bf16.msra.mxu1 %v646_v13  ;;  %617 = vmatprep.subr.bf16.mxu0 %v616_v17  ;;  %v650_v26 = vpack.c.bf16 %v264_v23, %v263_v21  ;;  %v620_v27 = vpack.c.bf16 %v250_v25, %v249_v24  ;;  %v281_v28 = vld [vmem:[%s776_s25 + $0x1a0] sm:$0xff]  ;;  %v282_v29 = vld [vmem:[%s776_s25 + $0x1a8] sm:$0xff]  ;;  %v251_v36 = vld [vmem:[%s776_s25 + $0xb0] sm:$0xff] }
  0x1f   : > { %649 = vmatprep.subr.bf16.mxu1 %v648_v18  ;;  %v233_v30 = vld [vmem:[%s776_s25 + $0x20] sm:$0xff]  ;;  %v652_v31 = vpack.c.bf16 %v282_v29, %v281_v28  ;;  %v234_v32 = vld [vmem:[%s776_s25 + $0x28] sm:$0xff]  ;;  %v252_v37 = vld [vmem:[%s776_s25 + $0xb8] sm:$0xff] }
  0x20   : > { %v265_v33 = vld [vmem:[%s776_s25 + $0x120] sm:$0xff]  ;;  %v266_v34 = vld [vmem:[%s776_s25 + $0x128] sm:$0xff]  ;;  %v622_v35 = vpack.c.bf16 %v234_v32, %v233_v30  ;;  %v283_v38 = vld [vmem:[%s776_s25 + $0x1b0] sm:$0xff]  ;;  %v624_v40 = vpack.c.bf16 %v252_v37, %v251_v36 }
  0x21   : > { %619 = vmatpush3.bf16.msra.mxu0 %v618_v22  ;;  %v654_v39 = vpack.c.bf16 %v266_v34, %v265_v33  ;;  %v284_v41 = vld [vmem:[%s776_s25 + $0x1b8] sm:$0xff]  ;;  %v235_v42 = vld [vmem:[%s776_s25 + $0x30] sm:$0xff]  ;;  %v253_v47 = vld [vmem:[%s776_s25 + $0xc0] sm:$0xff] }
  0x22   : > { %651 = vmatpush3.bf16.msra.mxu1 %v650_v26  ;;  %621 = vmatprep.subr.bf16.mxu0 %v620_v27  ;;  %v236_v43 = vld [vmem:[%s776_s25 + $0x38] sm:$0xff]  ;;  %v656_v44 = vpack.c.bf16 %v284_v41, %v283_v38  ;;  %v267_v45 = vld [vmem:[%s776_s25 + $0x130] sm:$0xff]  ;;  %v254_v48 = vld [vmem:[%s776_s25 + $0xc8] sm:$0xff] }
  0x23   : > { %653 = vmatprep.subr.bf16.mxu1 %v652_v31  ;;  %v268_v46 = vld [vmem:[%s776_s25 + $0x138] sm:$0xff]  ;;  %v285_v49 = vld [vmem:[%s776_s25 + $0x1c0] sm:$0xff]  ;;  %v286_v50 = vld [vmem:[%s776_s25 + $0x1c8] sm:$0xff]  ;;  %v626_v51 = vpack.c.bf16 %v236_v43, %v235_v42  ;;  %v628_v53 = vpack.c.bf16 %v254_v48, %v253_v47 }
  0x24   : > { %v658_v52 = vpack.c.bf16 %v268_v46, %v267_v45  ;;  %v237_v54 = vld [vmem:[%s776_s25 + $0x40] sm:$0xff]  ;;  %v238_v55 = vld [vmem:[%s776_s25 + $0x48] sm:$0xff]  ;;  %v660_v57 = vpack.c.bf16 %v286_v50, %v285_v49  ;;  %v255_v59 = vld [vmem:[%s776_s25 + $0xd0] sm:$0xff] }
  0x25   : > { %623 = vmatpush3.bf16.msra.mxu0 %v622_v35  ;;  %v269_v56 = vld [vmem:[%s776_s25 + $0x140] sm:$0xff]  ;;  %v270_v58 = vld [vmem:[%s776_s25 + $0x148] sm:$0xff]  ;;  %v256_v60 = vld [vmem:[%s776_s25 + $0xd8] sm:$0xff]  ;;  %v630_v63 = vpack.c.bf16 %v238_v55, %v237_v54 }
  0x26   : > { %655 = vmatpush3.bf16.msra.mxu1 %v654_v39  ;;  %625 = vmatprep.subr.bf16.mxu0 %v624_v40  ;;  %v287_v61 = vld [vmem:[%s776_s25 + $0x1d0] sm:$0xff]  ;;  %v288_v62 = vld [vmem:[%s776_s25 + $0x1d8] sm:$0xff]  ;;  %v662_v0 = vpack.c.bf16 %v270_v58, %v269_v56  ;;  %v632_v1 = vpack.c.bf16 %v256_v60, %v255_v59  ;;  %v257_v7 = vld [vmem:[%s776_s25 + $0xe0] sm:$0xff] }
  0x27   : > { %657 = vmatprep.subr.bf16.mxu1 %v656_v44  ;;  %v239_v2 = vld [vmem:[%s776_s25 + $0x50] sm:$0xff]  ;;  %v240_v3 = vld [vmem:[%s776_s25 + $0x58] sm:$0xff]  ;;  %v664_v5 = vpack.c.bf16 %v288_v62, %v287_v61  ;;  %v258_v8 = vld [vmem:[%s776_s25 + $0xe8] sm:$0xff] }
  0x28   : > { %v271_v4 = vld [vmem:[%s776_s25 + $0x150] sm:$0xff]  ;;  %v272_v6 = vld [vmem:[%s776_s25 + $0x158] sm:$0xff]  ;;  %v289_v9 = vld [vmem:[%s776_s25 + $0x1e0] sm:$0xff]  ;;  %v634_v11 = vpack.c.bf16 %v240_v3, %v239_v2  ;;  %v636_v15 = vpack.c.bf16 %v258_v8, %v257_v7 }
  0x29   : > { %627 = vmatpush3.bf16.msra.mxu0 %v626_v51  ;;  %v290_v10 = vld [vmem:[%s776_s25 + $0x1e8] sm:$0xff]  ;;  %v241_v12 = vld [vmem:[%s776_s25 + $0x60] sm:$0xff]  ;;  %v666_v14 = vpack.c.bf16 %v272_v6, %v271_v4  ;;  %v228_v18 = vld [vmem:[%s771_s21 + $0x18] sm:$0xff] }
  0x2a   : > { %659 = vmatpush3.bf16.msra.mxu1 %v658_v52  ;;  %629 = vmatprep.subr.bf16.mxu0 %v628_v53  ;;  %v242_v13 = vld [vmem:[%s776_s25 + $0x68] sm:$0xff]  ;;  %v273_v16 = vld [vmem:[%s776_s25 + $0x160] sm:$0xff]  ;;  %v668_v19 = vpack.c.bf16 %v290_v10, %v289_v9  ;;  %v259_v21 = vld [vmem:[%s776_s25 + $0xf0] sm:$0xff] }
  0x2b   : > { %661 = vmatprep.subr.bf16.mxu1 %v660_v57  ;;  %v226_v17 = vld [vmem:[%s771_s21 + $0x8] sm:$0xff]  ;;  %v260_v22 = vld [vmem:[%s776_s25 + $0xf8] sm:$0xff]  ;;  %v291_v23 = vld [vmem:[%s776_s25 + $0x1f0] sm:$0xff]  ;;  %428 = vmatprep.mubr.f32.mxu1 %v228_v18  ;;  %v638_v25 = vpack.c.bf16 %v242_v13, %v241_v12 }
  0x2c   : > { %v274_v20 = vld [vmem:[%s776_s25 + $0x168] sm:$0xff]  ;;  %358 = vmatprep.mubr.f32.mxu0 %v226_v17  ;;  %v292_v24 = vld [vmem:[%s776_s25 + $0x1f8] sm:$0xff]  ;;  %v640_v27 = vpack.c.bf16 %v260_v22, %v259_v21  ;;  %v243_v28 = vld [vmem:[%s776_s25 + $0x70] sm:$0xff] }
  0x2d   : > { %631 = vmatpush3.bf16.msra.mxu0 %v630_v63  ;;  %v670_v26 = vpack.c.bf16 %v274_v20, %v273_v16  ;;  %v244_v29 = vld [vmem:[%s776_s25 + $0x78] sm:$0xff]  ;;  %v672_v30 = vpack.c.bf16 %v292_v24, %v291_v23  ;;  %v275_v31 = vld [vmem:[%s776_s25 + $0x170] sm:$0xff]  ;;  %v225_v35 = vld [vmem:[%s771_s21] sm:$0xff] }
  0x2e   : > { %663 = vmatpush3.bf16.msra.mxu1 %v662_v0  ;;  %633 = vmatprep.subr.bf16.mxu0 %v632_v1  ;;  %v276_v32 = vld [vmem:[%s776_s25 + $0x178] sm:$0xff]  ;;  %v642_v33 = vpack.c.bf16 %v244_v29, %v243_v28  ;;  %v227_v36 = vld [vmem:[%s771_s21 + $0x10] sm:$0xff]  ;;  %v293_v43 = vld [vmem:[#allocation2] sm:$0xff] }
  0x2f   : > { %665 = vmatprep.subr.bf16.mxu1 %v664_v5  ;;  %v674_v34 = vpack.c.bf16 %v276_v32, %v275_v31  ;;  %v538_v47 = vld [vmem:[%s865_s2] ss:$0 sm:$0xff] (!%p537_p7) }
  0x31   : > { %635 = vmatpush3.bf16.msra.mxu0 %v634_v11 }
  0x32   : > { %667 = vmatpush3.bf16.msra.mxu1 %v666_v14  ;;  %637 = vmatprep.subr.bf16.mxu0 %v636_v15 }
  0x33   : > { %669 = vmatprep.subr.bf16.mxu1 %v668_v19 }
  0x35   : > { %639 = vmatpush3.bf16.msra.mxu0 %v638_v25 }
  0x36   : > { %671 = vmatpush3.bf16.msra.mxu1 %v670_v26  ;;  %641 = vmatprep.subr.bf16.mxu0 %v640_v27 }
  0x37   : > { %673 = vmatprep.subr.bf16.mxu1 %v672_v30 }
  0x39   : > { %643 = vmatpush3.bf16.msra.mxu0 %v642_v33 }
  0x3a   : > { %675 = vmatpush3.bf16.msra.mxu1 %v674_v34 }
  0x3c   : > { %359 = vmatmul.mubr.f32.vlgmr.msra.gmra.mrb[0].mxu0 %v225_v35 }
  0x3d   : > { %429 = vmatmul.mubr.f32.vlgmr.msra.gmra.mrb[0].mxu1 %v227_v36 }
 0x10f   : > { %v574_v37 = vpop.f32.mrb[0].mxu0 }
 0x110   : > { %v609_v38 = vpop.f32.mrb[0].mxu1  ;;  %v575_v39 = vpop.f32.mrb[1].mxu0 }
 0x111   : > { %v576_v40 = vadd.f32 %v575_v39, %v574_v37  ;;  %v610_v41 = vpop.f32.mrb[1].mxu1 }
 0x112   : > { %v611_v42 = vadd.f32 %v610_v41, %v609_v38  ;;  %440 = sbr.rel (%p537_p7) target bundleno = 291 (0x123), region = 40 }
 0x114   : > { %v431_v44 = vadd.f32 %v611_v42, %v576_v40 }
 0x116   : > { %v434_v45 = vadd.f32 %v431_v44, %v293_v43 }
 0x118   : > { %436 = vst.msk [vmem:[#allocation2] sm:$0xff] %vm435_vm1, %v434_v45 }
 0x11f   : > { %v441_v46 = vld [vmem:[#allocation2] sm:$0xff] }
 0x120   : > { %v449_v48 = vadd.f32 %v538_v47, %v441_v46 }
 0x122   : > { %450 = vst.msk [vmem:[%s866_s3] sm:$0xff] %vm435_vm1, %v449_v48 }
 0x123 PF: > { %s13_s14 = sadd.s32 1, %s723_s14   ;;  %s867_s12 = smov %s719_s13 }
 0x124   : > { %p10_p8 = scmp.ge.s32.totalorder %s13_s14, 4   ;;  %s868_s13 = smov %s870_s15 }
 0x126   :  { %12 = sbr.rel (!%p10_p8) target bundleno = 2 (0x2), region = 73 }

// kernel: fwd_pallas.12
= control target key start
LH: loop header
LB: loop body
LE: loop exit
PB: predicated region body
PF: predicated region fallthrough
CT: control target
= control target key end

     0   :  { %vm18_vm0 = vcmask 261120   ;;  %v149_v0 = vmov 0.0|0.0   ;;  %v150_v4 = vmov 0.0   ;;  %vm151_vm1 = vmmov 0   ;;  %s197_s1 = inlined_call_operand.vmem [shape: f32[32,32], index: 1, kind: input, shape index: {}]   ;;  %s198_s0 = inlined_call_operand.vmem [shape: f32[8,32], index: 0, kind: input, shape index: {}]   ;;  %s199_s2 = inlined_call_operand.vmem [shape: f32[1,32], index: 2, kind: input, shape index: {}]   ;;  %s200_s3 = inlined_call_operand.vmem [shape: f32[8,32], index: 3, kind: output, shape index: {}]  }
   0x1   :  { %138 = vmatprep.subr.bf16.mxu0 %v149_v0  ;;  %v21_v1 = vld [vmem:[%s197_s1] sm:$0xff]  ;;  %v22_v2 = vld [vmem:[%s197_s1 + $0x8] sm:$0xff]  ;;  %v23_v3 = vld [vmem:[%s197_s1 + $0x10] sm:$0xff]  ;;  %19 = vst.msk [vmem:[#allocation2] sm:$0xff] %vm18_vm0, %v150_v4  ;;  %135 = vmatprep.mubr.msk.f32.mxu0 %vm151_vm1, %v150_v4 }
   0x2   :  { %v139_v5 = vpack.c.bf16 %v22_v2, %v21_v1  ;;  %v24_v6 = vld [vmem:[%s197_s1 + $0x18] sm:$0xff]  ;;  %v20_v8 = vld [vmem:[%s198_s0] sm:$0xff] }
   0x3   :  { %v142_v7 = vpack.c.bf16 %v24_v6, %v23_v3  ;;  %v121_v13 = vld [vmem:[%s199_s2] ss:$0 sm:$0xff] }
   0x4   :  { %140 = vmatpush3.bf16.msra.mxu0 %v139_v5 }
   0x5   :  { %141 = vmatprep.subr.bf16.mxu0 %v149_v0 }
   0x8   :  { %143 = vmatpush3.bf16.msra.mxu0 %v142_v7  ;;  %v25_v9 = vld [vmem:[#allocation2] sm:$0xff] }
   0xb   :  { %136 = vmatmul.mubr.msk.f32.vlgmr.msra.gmra.mrb[0].mxu0 %vm18_vm0, %v20_v8 }
  0xde   :  { %v96_v10 = vpop.f32.mrb[0].mxu0 }
  0xdf   :  { %v100_v11 = vadd.f32 %v96_v10, %v25_v9  ;;  %v137_v12 = vpop.f32.mrb[1].mxu0 }
  0xe1   :  { %101 = vst.msk [vmem:[#allocation2] sm:$0xff] %vm18_vm0, %v100_v11 }
  0xe8   :  { %v105_v14 = vld [vmem:[#allocation2] sm:$0xff] }
  0xe9   :  { %v113_v15 = vadd.f32 %v121_v13, %v105_v14 }
  0xeb   :  { %147 = vtanh.f32 %v113_v15 }
  0xf5   :  { %v148_v16 = vpop.eup %147 }
  0xf6   :  { %115 = vst.msk [vmem:[%s200_s3] sm:$0xff] %vm18_vm0, %v148_v16 }

// kernel: fwd_pallas.11
= control target key start
LH: loop header
LB: loop body
LE: loop exit
PB: predicated region body
PF: predicated region fallthrough
CT: control target
= control target key end

     0   :  { %s1166_s12 = smov 0   ;;  %s1168_s13 = smov 0   ;;  %s1429_s0 = inlined_call_operand.vmem [shape: f32[8,1032], index: 0, kind: input, shape index: {}]   ;;  %s1430_s1 = inlined_call_operand.vmem [shape: f32[1032,32], index: 1, kind: input, shape index: {}]   ;;  %s1431_s2 = inlined_call_operand.vmem [shape: f32[1,32], index: 2, kind: input, shape index: {}]   ;;  %s1432_s3 = inlined_call_operand.vmem [shape: f32[8,32], index: 3, kind: output, shape index: {}]  }
   0x1   :  { %s1170_s14 = smov 0  }
   0x2 LB: > { %s22_s15 = sadd.s32 1, %s1139_s13  ;;  %p848_p0 = scmp.ge.s32.totalorder %s1143_s14, 1  ;;  %s1143_s14 = sphi %s1170_s14, %s13_s14   ;;  %s1139_s13 = sphi %s1168_s13, %s1434_s13   ;;  %s1135_s12 = sphi %s1166_s12, %s1433_s12  }
   0x3   : > { %p23_p1 = scmp.ge.s32.totalorder %s22_s15, 3  ;;  %p183_p2 = scmp.lt.s32.totalorder %s1143_s14, 4 }
   0x5   : > { %s1436_s15 = smov (%p23_p1, %s22_s15), 0  ;;  %p184_p3 = pnand %p848_p0, %p183_p2 }
   0x6   : > { %s849_s16 = sshll.u32 (!%p184_p3), %s1135_s12, 2  ;;  %s851_s17 = sshll.u32 (!%p184_p3), %s1135_s12, 6 }
   0x7   : > { %187 = sbr.rel (%p184_p3) target bundleno = 330 (0x14a), region = 32  ;;  %p230_p4 = scmp.lt.s32.totalorder (!%p184_p3), %s849_s16, 8 }
   0x8   : > { %p246_p5 = scmp.lt.s32.totalorder (!%p184_p3), %s851_s17, 128  ;;  %p853_p6 = scmp.ne.s32.totalorder (!%p184_p3), %s1135_s12, 0 }
   0xe   : > { %s1438_s16 = smov (!%p230_p4, %s849_s16), 8  ;;  %s1440_s17 = smov (!%p246_p5, %s851_s17), 128 }
   0xf   : > { %s850_s18 = sshll.u32 %s1438_s16, 3  ;;  %s852_s22 = sshll.u32 %s1440_s17, 3  ;;  %vm263_vm0 = vcmask (!%p853_p6), 261120   ;;  %v1145_v0 = vmov (!%p853_p6), 0.0  }
  0x10   : > { %s1191_s21 = scalar_lea.vmem %s1429_s0, %s850_s18  ;;  %s1196_s25 = scalar_lea.vmem %s1430_s1, %s852_s22  ;;  %264 = vst.msk [vmem:[#allocation2] sm:$0xff] (!%p853_p6), %vm263_vm0, %v1145_v0 }
  0x11   : > { %262 = sbr.rel (%p853_p6) target bundleno = 24 (0x18), region = 36 }
  0x18 PF: > { %v285_v1 = vld [vmem:[%s1196_s25 + $0x80] sm:$0xff]  ;;  %v286_v2 = vld [vmem:[%s1196_s25 + $0x88] sm:$0xff]  ;;  %s854_s26 = sshll.u32 %s1135_s12, 9  ;;  %v334_v3 = vlaneseq  ;;  %v287_v32 = vld [vmem:[%s1196_s25 + $0x90] sm:$0xff]  ;;  %p923_p7 = scmp.ne.s32.totalorder %s1135_s12, 2 }
  0x19   : > { %v317_v4 = vld [vmem:[%s1196_s25 + $0x180] sm:$0xff]  ;;  %v318_v5 = vld [vmem:[%s1196_s25 + $0x188] sm:$0xff]  ;;  %v1206_v8 = vstv %s854_s26  ;;  %v998_v10 = vpack.c.bf16 %v286_v2, %v285_v1  ;;  %v288_v33 = vld [vmem:[%s1196_s25 + $0x98] sm:$0xff] }
  0x1a   : > { %v269_v6 = vld [vmem:[%s1196_s25] sm:$0xff]  ;;  %v270_v7 = vld [vmem:[%s1196_s25 + $0x8] sm:$0xff]  ;;  %v1208_v9 = vshrl.u32 %v334_v3, 7  ;;  %v1046_v13 = vpack.c.bf16 %v318_v5, %v317_v4  ;;  %v1212_v16 = vand.u32 127, %v334_v3  ;;  %v319_v34 = vld [vmem:[%s1196_s25 + $0x190] sm:$0xff]  ;;  %v1004_v40 = vpack.c.bf16 %v288_v33, %v287_v32 }
  0x1b   : > { %v301_v11 = vld [vmem:[%s1196_s25 + $0x100] sm:$0xff]  ;;  %v302_v12 = vld [vmem:[%s1196_s25 + $0x108] sm:$0xff]  ;;  %v1001_v14 = vpack.c.bf16 %v270_v7, %v269_v6  ;;  %v320_v35 = vld [vmem:[%s1196_s25 + $0x198] sm:$0xff] }
  0x1c   : > { %v1049_v15 = vpack.c.bf16 %v302_v12, %v301_v11  ;;  %v369_v17 = vadd.s32 128, %v1208_v9  ;;  %v370_v18 = vadd.s32 136, %v1208_v9  ;;  %v401_v19 = vadd.s32 384, %v1208_v9  ;;  %v271_v37 = vld [vmem:[%s1196_s25 + $0x10] sm:$0xff]  ;;  %v272_v38 = vld [vmem:[%s1196_s25 + $0x18] sm:$0xff]  ;;  %v289_v56 = vld [vmem:[%s1196_s25 + $0xa0] sm:$0xff] }
  0x1d   : > { %v402_v20 = vadd.s32 392, %v1208_v9  ;;  %v354_v21 = vadd.s32 8, %v1208_v9  ;;  %v417_v22 = vadd.s32 %v1208_v9, %v1206_v8  ;;  %v385_v23 = vadd.s32 256, %v1208_v9  ;;  %v303_v51 = vld [vmem:[%s1196_s25 + $0x110] sm:$0xff]  ;;  %v304_v52 = vld [vmem:[%s1196_s25 + $0x118] sm:$0xff]  ;;  %v290_v57 = vld [vmem:[%s1196_s25 + $0xa8] sm:$0xff] }
  0x1e   : > { %v386_v24 = vadd.s32 264, %v1208_v9  ;;  %v433_v25 = vadd.s32 %v369_v17, %v1206_v8  ;;  %v434_v26 = vadd.s32 %v370_v18, %v1206_v8  ;;  %v465_v27 = vadd.s32 %v401_v19, %v1206_v8  ;;  %v321_v59 = vld [vmem:[%s1196_s25 + $0x1a0] sm:$0xff]  ;;  %v322_v60 = vld [vmem:[%s1196_s25 + $0x1a8] sm:$0xff] }
  0x1f   : > { %v466_v28 = vadd.s32 %v402_v20, %v1206_v8  ;;  %v418_v29 = vadd.s32 %v354_v21, %v1206_v8  ;;  %vm481_vm1 = vcmp.lt.s32.totalorder %v417_v22, 1032  ;;  %v449_v30 = vadd.s32 %v385_v23, %v1206_v8  ;;  %v273_v3 = vld [vmem:[%s1196_s25 + $0x20] sm:$0xff]  ;;  %v274_v4 = vld [vmem:[%s1196_s25 + $0x28] sm:$0xff]  ;;  %v291_v22 = vld [vmem:[%s1196_s25 + $0xb0] sm:$0xff] }
  0x20   : > { %v450_v31 = vadd.s32 %v386_v24, %v1206_v8  ;;  %vm497_vm2 = vcmp.lt.s32.totalorder %v433_v25, 1032  ;;  %vm498_vm3 = vcmp.lt.s32.totalorder %v434_v26, 1032  ;;  %vm529_vm4 = vcmp.lt.s32.totalorder %v465_v27, 1032  ;;  %v305_v18 = vld [vmem:[%s1196_s25 + $0x120] sm:$0xff]  ;;  %v306_v19 = vld [vmem:[%s1196_s25 + $0x128] sm:$0xff]  ;;  %v292_v23 = vld [vmem:[%s1196_s25 + $0xb8] sm:$0xff] }
  0x21   : > { %vm530_vm5 = vcmp.lt.s32.totalorder %v466_v28, 1032  ;;  %vm999_vm6 = vmpackc.low %vm498_vm3, %vm497_vm2  ;;  %vm482_vm7 = vcmp.lt.s32.totalorder %v418_v29, 1032  ;;  %vm513_vm8 = vcmp.lt.s32.totalorder %v449_v30, 1032  ;;  %v371_v36 = vadd.s32 144, %v1208_v9  ;;  %v323_v29 = vld [vmem:[%s1196_s25 + $0x1b0] sm:$0xff]  ;;  %v324_v30 = vld [vmem:[%s1196_s25 + $0x1b8] sm:$0xff] }
  0x22   : > { %vm514_vm9 = vcmp.lt.s32.totalorder %v450_v31, 1032  ;;  %1000 = vmatprep.subr.msk.bf16.mxu0 %vm999_vm6, %v998_v10  ;;  %vm1047_vm10 = vmpackc.low %vm530_vm5, %vm529_vm4  ;;  %v372_v39 = vadd.s32 152, %v1208_v9  ;;  %v403_v41 = vadd.s32 400, %v1208_v9  ;;  %v404_v42 = vadd.s32 408, %v1208_v9 }
  0x23   : > { %1048 = vmatprep.subr.msk.bf16.mxu1 %vm1047_vm10, %v1046_v13  ;;  %vm1002_vm11 = vmpackc.low %vm482_vm7, %vm481_vm1  ;;  %v435_v43 = vadd.s32 %v371_v36, %v1206_v8  ;;  %v1052_v44 = vpack.c.bf16 %v320_v35, %v319_v34  ;;  %v355_v45 = vadd.s32 16, %v1208_v9  ;;  %v356_v46 = vadd.s32 24, %v1208_v9 }
  0x24   : > { %1003 = vmatpush3.bf16.msk.msra.mxu0 %vm1002_vm11, %v1001_v14  ;;  %vm1050_vm12 = vmpackc.low %vm514_vm9, %vm513_vm8  ;;  %v436_v47 = vadd.s32 %v372_v39, %v1206_v8  ;;  %v467_v48 = vadd.s32 %v403_v41, %v1206_v8  ;;  %v468_v49 = vadd.s32 %v404_v42, %v1206_v8  ;;  %v1007_v50 = vpack.c.bf16 %v272_v38, %v271_v37  ;;  %v275_v37 = vld [vmem:[%s1196_s25 + $0x30] sm:$0xff]  ;;  %v276_v38 = vld [vmem:[%s1196_s25 + $0x38] sm:$0xff] }
  0x25   : > { %1051 = vmatpush3.bf16.msk.msra.mxu1 %vm1050_vm12, %v1049_v15  ;;  %vm499_vm13 = vcmp.lt.s32.totalorder %v435_v43, 1032  ;;  %v419_v53 = vadd.s32 %v355_v45, %v1206_v8  ;;  %v420_v54 = vadd.s32 %v356_v46, %v1206_v8  ;;  %v387_v55 = vadd.s32 272, %v1208_v9  ;;  %v307_v45 = vld [vmem:[%s1196_s25 + $0x130] sm:$0xff]  ;;  %v308_v46 = vld [vmem:[%s1196_s25 + $0x138] sm:$0xff] }
  0x26   : > { %vm500_vm14 = vcmp.lt.s32.totalorder %v436_v47, 1032  ;;  %vm531_vm15 = vcmp.lt.s32.totalorder %v467_v48, 1032  ;;  %vm532_vm0 = vcmp.lt.s32.totalorder %v468_v49, 1032  ;;  %v388_v58 = vadd.s32 280, %v1208_v9 }
  0x27   : > { %vm1005_vm1 = vmpackc.low %vm500_vm14, %vm499_vm13  ;;  %vm483_vm2 = vcmp.lt.s32.totalorder %v419_v53, 1032  ;;  %vm484_vm3 = vcmp.lt.s32.totalorder %v420_v54, 1032  ;;  %v451_v61 = vadd.s32 %v387_v55, %v1206_v8  ;;  %v1055_v62 = vpack.c.bf16 %v304_v52, %v303_v51  ;;  %v294_v51 = vld [vmem:[%s1196_s25 + $0xc8] sm:$0xff] }
  0x28   : > { %1006 = vmatprep.subr.msk.bf16.mxu0 %vm1005_vm1, %v1004_v40  ;;  %vm1053_vm4 = vmpackc.low %vm532_vm0, %vm531_vm15  ;;  %v452_v63 = vadd.s32 %v388_v58, %v1206_v8  ;;  %v373_v0 = vadd.s32 160, %v1208_v9  ;;  %v374_v1 = vadd.s32 168, %v1208_v9  ;;  %v1010_v2 = vpack.c.bf16 %v290_v57, %v289_v56  ;;  %v325_v57 = vld [vmem:[%s1196_s25 + $0x1c0] sm:$0xff]  ;;  %v326_v58 = vld [vmem:[%s1196_s25 + $0x1c8] sm:$0xff] }
  0x29   : > { %1054 = vmatprep.subr.msk.bf16.mxu1 %vm1053_vm4, %v1052_v44  ;;  %vm1008_vm5 = vmpackc.low %vm484_vm3, %vm483_vm2  ;;  %vm515_vm6 = vcmp.lt.s32.totalorder %v451_v61, 1032  ;;  %v405_v5 = vadd.s32 416, %v1208_v9  ;;  %v406_v6 = vadd.s32 424, %v1208_v9  ;;  %v1058_v7 = vpack.c.bf16 %v322_v60, %v321_v59 }
  0x2a   : > { %1009 = vmatpush3.bf16.msk.msra.mxu0 %vm1008_vm5, %v1007_v50  ;;  %vm516_vm7 = vcmp.lt.s32.totalorder %v452_v63, 1032  ;;  %v437_v10 = vadd.s32 %v373_v0, %v1206_v8  ;;  %v438_v11 = vadd.s32 %v374_v1, %v1206_v8  ;;  %v357_v12 = vadd.s32 32, %v1208_v9  ;;  %v293_v50 = vld [vmem:[%s1196_s25 + $0xc0] sm:$0xff] }
  0x2b   : > { %vm1056_vm8 = vmpackc.low %vm516_vm7, %vm515_vm6  ;;  %v469_v13 = vadd.s32 %v405_v5, %v1206_v8  ;;  %v470_v14 = vadd.s32 %v406_v6, %v1206_v8  ;;  %v358_v15 = vadd.s32 40, %v1208_v9  ;;  %v1013_v17 = vpack.c.bf16 %v274_v4, %v273_v3  ;;  %v277_v1 = vld [vmem:[%s1196_s25 + $0x40] sm:$0xff] }
  0x2c   : > { %1057 = vmatpush3.bf16.msk.msra.mxu1 %vm1056_vm8, %v1055_v62  ;;  %vm501_vm9 = vcmp.lt.s32.totalorder %v437_v10, 1032  ;;  %vm502_vm10 = vcmp.lt.s32.totalorder %v438_v11, 1032  ;;  %v421_v20 = vadd.s32 %v357_v12, %v1206_v8  ;;  %v389_v21 = vadd.s32 288, %v1208_v9  ;;  %v309_v11 = vld [vmem:[%s1196_s25 + $0x140] sm:$0xff]  ;;  %v310_v12 = vld [vmem:[%s1196_s25 + $0x148] sm:$0xff] }
  0x2d   : > { %vm1011_vm11 = vmpackc.low %vm502_vm10, %vm501_vm9  ;;  %vm533_vm12 = vcmp.lt.s32.totalorder %v469_v13, 1032  ;;  %vm534_vm13 = vcmp.lt.s32.totalorder %v470_v14, 1032  ;;  %v422_v24 = vadd.s32 %v358_v15, %v1206_v8  ;;  %v390_v25 = vadd.s32 296, %v1208_v9 }
  0x2e   : > { %1012 = vmatprep.subr.msk.bf16.mxu0 %vm1011_vm11, %v1010_v2  ;;  %vm1059_vm14 = vmpackc.low %vm534_vm13, %vm533_vm12  ;;  %vm485_vm15 = vcmp.lt.s32.totalorder %v421_v20, 1032  ;;  %v453_v26 = vadd.s32 %v389_v21, %v1206_v8  ;;  %v1061_v27 = vpack.c.bf16 %v306_v19, %v305_v18  ;;  %v375_v28 = vadd.s32 176, %v1208_v9  ;;  %v278_v2 = vld [vmem:[%s1196_s25 + $0x48] sm:$0xff]  ;;  %v296_v18 = vld [vmem:[%s1196_s25 + $0xd8] sm:$0xff] }
  0x2f   : > { %1060 = vmatprep.subr.msk.bf16.mxu1 %vm1059_vm14, %v1058_v7  ;;  %vm486_vm0 = vcmp.lt.s32.totalorder %v422_v24, 1032  ;;  %v454_v31 = vadd.s32 %v390_v25, %v1206_v8  ;;  %v376_v32 = vadd.s32 184, %v1208_v9  ;;  %v1016_v33 = vpack.c.bf16 %v292_v23, %v291_v22  ;;  %v327_v24 = vld [vmem:[%s1196_s25 + $0x1d0] sm:$0xff]  ;;  %v328_v25 = vld [vmem:[%s1196_s25 + $0x1d8] sm:$0xff] }
  0x30   : > { %vm1014_vm1 = vmpackc.low %vm486_vm0, %vm485_vm15  ;;  %vm517_vm2 = vcmp.lt.s32.totalorder %v453_v26, 1032  ;;  %v439_v34 = vadd.s32 %v375_v28, %v1206_v8  ;;  %v407_v35 = vadd.s32 432, %v1208_v9  ;;  %v408_v36 = vadd.s32 440, %v1208_v9 }
  0x31   : > { %1015 = vmatpush3.bf16.msk.msra.mxu0 %vm1014_vm1, %v1013_v17  ;;  %vm518_vm3 = vcmp.lt.s32.totalorder %v454_v31, 1032  ;;  %v440_v39 = vadd.s32 %v376_v32, %v1206_v8  ;;  %v1064_v40 = vpack.c.bf16 %v324_v30, %v323_v29  ;;  %v359_v41 = vadd.s32 48, %v1208_v9  ;;  %v295_v17 = vld [vmem:[%s1196_s25 + $0xd0] sm:$0xff] }
  0x32   : > { %vm1062_vm4 = vmpackc.low %vm518_vm3, %vm517_vm2  ;;  %vm503_vm5 = vcmp.lt.s32.totalorder %v439_v34, 1032  ;;  %v471_v42 = vadd.s32 %v407_v35, %v1206_v8  ;;  %v472_v43 = vadd.s32 %v408_v36, %v1206_v8  ;;  %v360_v44 = vadd.s32 56, %v1208_v9  ;;  %v279_v32 = vld [vmem:[%s1196_s25 + $0x50] sm:$0xff] }
  0x33   : > { %1063 = vmatpush3.bf16.msk.msra.mxu1 %vm1062_vm4, %v1061_v27  ;;  %vm504_vm6 = vcmp.lt.s32.totalorder %v440_v39, 1032  ;;  %v423_v47 = vadd.s32 %v359_v41, %v1206_v8  ;;  %v1019_v48 = vpack.c.bf16 %v276_v38, %v275_v37  ;;  %v391_v49 = vadd.s32 304, %v1208_v9  ;;  %v312_v41 = vld [vmem:[%s1196_s25 + $0x158] sm:$0xff] }
  0x34   : > { %vm1017_vm7 = vmpackc.low %vm504_vm6, %vm503_vm5  ;;  %vm535_vm8 = vcmp.lt.s32.totalorder %v471_v42, 1032  ;;  %vm536_vm9 = vcmp.lt.s32.totalorder %v472_v43, 1032  ;;  %v424_v52 = vadd.s32 %v360_v44, %v1206_v8  ;;  %v392_v53 = vadd.s32 312, %v1208_v9 }
  0x35   : > { %1018 = vmatprep.subr.msk.bf16.mxu0 %vm1017_vm7, %v1016_v33  ;;  %vm1065_vm10 = vmpackc.low %vm536_vm9, %vm535_vm8  ;;  %vm487_vm11 = vcmp.lt.s32.totalorder %v423_v47, 1032  ;;  %v455_v54 = vadd.s32 %v391_v49, %v1206_v8  ;;  %v1067_v55 = vpack.c.bf16 %v308_v46, %v307_v45  ;;  %v377_v56 = vadd.s32 192, %v1208_v9  ;;  %v280_v33 = vld [vmem:[%s1196_s25 + $0x58] sm:$0xff]  ;;  %v297_v45 = vld [vmem:[%s1196_s25 + $0xe0] sm:$0xff] }
  0x36   : > { %1066 = vmatprep.subr.msk.bf16.mxu1 %vm1065_vm10, %v1064_v40  ;;  %vm488_vm12 = vcmp.lt.s32.totalorder %v424_v52, 1032  ;;  %v456_v59 = vadd.s32 %v392_v53, %v1206_v8  ;;  %v378_v60 = vadd.s32 200, %v1208_v9  ;;  %v1022_v61 = vpack.c.bf16 %v294_v51, %v293_v50  ;;  %v311_v40 = vld [vmem:[%s1196_s25 + $0x150] sm:$0xff]  ;;  %v298_v46 = vld [vmem:[%s1196_s25 + $0xe8] sm:$0xff]  ;;  %v329_v52 = vld [vmem:[%s1196_s25 + $0x1e0] sm:$0xff] }
  0x37   : > { %vm1020_vm13 = vmpackc.low %vm488_vm12, %vm487_vm11  ;;  %vm519_vm14 = vcmp.lt.s32.totalorder %v455_v54, 1032  ;;  %v441_v62 = vadd.s32 %v377_v56, %v1206_v8  ;;  %v409_v63 = vadd.s32 448, %v1208_v9  ;;  %v410_v0 = vadd.s32 456, %v1208_v9  ;;  %v330_v53 = vld [vmem:[%s1196_s25 + $0x1e8] sm:$0xff] }
  0x38   : > { %1021 = vmatpush3.bf16.msk.msra.mxu0 %vm1020_vm13, %v1019_v48  ;;  %vm520_vm15 = vcmp.lt.s32.totalorder %v456_v59, 1032  ;;  %v442_v3 = vadd.s32 %v378_v60, %v1206_v8  ;;  %v1070_v4 = vpack.c.bf16 %v326_v58, %v325_v57  ;;  %v361_v5 = vadd.s32 64, %v1208_v9  ;;  %v281_v60 = vld [vmem:[%s1196_s25 + $0x60] sm:$0xff] }
  0x39   : > { %vm1068_vm0 = vmpackc.low %vm520_vm15, %vm519_vm14  ;;  %vm505_vm1 = vcmp.lt.s32.totalorder %v441_v62, 1032  ;;  %v473_v6 = vadd.s32 %v409_v63, %v1206_v8  ;;  %v474_v7 = vadd.s32 %v410_v0, %v1206_v8  ;;  %v362_v10 = vadd.s32 72, %v1208_v9 }
  0x3a   : > { %1069 = vmatpush3.bf16.msk.msra.mxu1 %vm1068_vm0, %v1067_v55  ;;  %vm506_vm2 = vcmp.lt.s32.totalorder %v442_v3, 1032  ;;  %v425_v13 = vadd.s32 %v361_v5, %v1206_v8  ;;  %v1025_v14 = vpack.c.bf16 %v278_v2, %v277_v1  ;;  %v393_v15 = vadd.s32 320, %v1208_v9  ;;  %v314_v5 = vld [vmem:[%s1196_s25 + $0x168] sm:$0xff] }
  0x3b   : > { %vm1023_vm3 = vmpackc.low %vm506_vm2, %vm505_vm1  ;;  %vm537_vm4 = vcmp.lt.s32.totalorder %v473_v6, 1032  ;;  %vm538_vm5 = vcmp.lt.s32.totalorder %v474_v7, 1032  ;;  %v426_v19 = vadd.s32 %v362_v10, %v1206_v8  ;;  %v394_v20 = vadd.s32 328, %v1208_v9 }
  0x3c   : > { %1024 = vmatprep.subr.msk.bf16.mxu0 %vm1023_vm3, %v1022_v61  ;;  %vm1071_vm6 = vmpackc.low %vm538_vm5, %vm537_vm4  ;;  %vm489_vm7 = vcmp.lt.s32.totalorder %v425_v13, 1032  ;;  %v457_v21 = vadd.s32 %v393_v15, %v1206_v8  ;;  %v1073_v22 = vpack.c.bf16 %v310_v12, %v309_v11  ;;  %v379_v23 = vadd.s32 208, %v1208_v9  ;;  %v282_v61 = vld [vmem:[%s1196_s25 + $0x68] sm:$0xff]  ;;  %v299_v11 = vld [vmem:[%s1196_s25 + $0xf0] sm:$0xff] }
  0x3d   : > { %1072 = vmatprep.subr.msk.bf16.mxu1 %vm1071_vm6, %v1070_v4  ;;  %vm490_vm8 = vcmp.lt.s32.totalorder %v426_v19, 1032  ;;  %v458_v26 = vadd.s32 %v394_v20, %v1206_v8  ;;  %v380_v27 = vadd.s32 216, %v1208_v9  ;;  %v1028_v28 = vpack.c.bf16 %v296_v18, %v295_v17  ;;  %v313_v4 = vld [vmem:[%s1196_s25 + $0x160] sm:$0xff]  ;;  %v300_v12 = vld [vmem:[%s1196_s25 + $0xf8] sm:$0xff]  ;;  %v331_v19 = vld [vmem:[%s1196_s25 + $0x1f0] sm:$0xff] }
  0x3e   : > { %vm1026_vm9 = vmpackc.low %vm490_vm8, %vm489_vm7  ;;  %vm521_vm10 = vcmp.lt.s32.totalorder %v457_v21, 1032  ;;  %v443_v29 = vadd.s32 %v379_v23, %v1206_v8  ;;  %v411_v30 = vadd.s32 464, %v1208_v9  ;;  %v412_v31 = vadd.s32 472, %v1208_v9  ;;  %v332_v20 = vld [vmem:[%s1196_s25 + $0x1f8] sm:$0xff] }
  0x3f   : > { %1027 = vmatpush3.bf16.msk.msra.mxu0 %vm1026_vm9, %v1025_v14  ;;  %vm522_vm11 = vcmp.lt.s32.totalorder %v458_v26, 1032  ;;  %v444_v34 = vadd.s32 %v380_v27, %v1206_v8  ;;  %v1076_v35 = vpack.c.bf16 %v328_v25, %v327_v24  ;;  %v363_v36 = vadd.s32 80, %v1208_v9  ;;  %v283_v27 = vld [vmem:[%s1196_s25 + $0x70] sm:$0xff] }
  0x40   : > { %vm1074_vm12 = vmpackc.low %vm522_vm11, %vm521_vm10  ;;  %vm507_vm13 = vcmp.lt.s32.totalorder %v443_v29, 1032  ;;  %v475_v37 = vadd.s32 %v411_v30, %v1206_v8  ;;  %v476_v38 = vadd.s32 %v412_v31, %v1206_v8  ;;  %v364_v39 = vadd.s32 88, %v1208_v9 }
  0x41   : > { %1075 = vmatpush3.bf16.msk.msra.mxu1 %vm1074_vm12, %v1073_v22  ;;  %vm508_vm14 = vcmp.lt.s32.totalorder %v444_v34, 1032  ;;  %v427_v42 = vadd.s32 %v363_v36, %v1206_v8  ;;  %v1031_v43 = vpack.c.bf16 %v280_v33, %v279_v32  ;;  %v395_v44 = vadd.s32 336, %v1208_v9  ;;  %v316_v36 = vld [vmem:[%s1196_s25 + $0x178] sm:$0xff] }
  0x42   : > { %vm1029_vm15 = vmpackc.low %vm508_vm14, %vm507_vm13  ;;  %vm539_vm0 = vcmp.lt.s32.totalorder %v475_v37, 1032  ;;  %vm540_vm1 = vcmp.lt.s32.totalorder %v476_v38, 1032  ;;  %v428_v47 = vadd.s32 %v364_v39, %v1206_v8  ;;  %v396_v48 = vadd.s32 344, %v1208_v9 }
  0x43   : > { %1030 = vmatprep.subr.msk.bf16.mxu0 %vm1029_vm15, %v1028_v28  ;;  %vm1077_vm2 = vmpackc.low %vm540_vm1, %vm539_vm0  ;;  %vm491_vm3 = vcmp.lt.s32.totalorder %v427_v42, 1032  ;;  %v459_v49 = vadd.s32 %v395_v44, %v1206_v8  ;;  %v1079_v50 = vpack.c.bf16 %v312_v41, %v311_v40  ;;  %v381_v51 = vadd.s32 224, %v1208_v9  ;;  %v284_v28 = vld [vmem:[%s1196_s25 + $0x78] sm:$0xff] }
  0x44   : > { %1078 = vmatprep.subr.msk.bf16.mxu1 %vm1077_vm2, %v1076_v35  ;;  %vm492_vm4 = vcmp.lt.s32.totalorder %v428_v47, 1032  ;;  %v460_v54 = vadd.s32 %v396_v48, %v1206_v8  ;;  %v382_v55 = vadd.s32 232, %v1208_v9  ;;  %v1034_v56 = vpack.c.bf16 %v298_v46, %v297_v45  ;;  %v315_v35 = vld [vmem:[%s1196_s25 + $0x170] sm:$0xff] }
  0x45   : > { %vm1032_vm5 = vmpackc.low %vm492_vm4, %vm491_vm3  ;;  %vm523_vm6 = vcmp.lt.s32.totalorder %v459_v49, 1032  ;;  %v445_v57 = vadd.s32 %v381_v51, %v1206_v8  ;;  %v413_v58 = vadd.s32 480, %v1208_v9  ;;  %v414_v59 = vadd.s32 488, %v1208_v9 }
  0x46   : > { %1033 = vmatpush3.bf16.msk.msra.mxu0 %vm1032_vm5, %v1031_v43  ;;  %vm524_vm7 = vcmp.lt.s32.totalorder %v460_v54, 1032  ;;  %v446_v62 = vadd.s32 %v382_v55, %v1206_v8  ;;  %v1082_v63 = vpack.c.bf16 %v330_v53, %v329_v52  ;;  %v365_v0 = vadd.s32 96, %v1208_v9  ;;  %v265_v52 = vld [vmem:[%s1191_s21] sm:$0xff]  ;;  %v267_v54 = vld [vmem:[%s1191_s21 + $0x10] sm:$0xff] }
  0x47   : > { %vm1080_vm8 = vmpackc.low %vm524_vm7, %vm523_vm6  ;;  %vm509_vm9 = vcmp.lt.s32.totalorder %v445_v57, 1032  ;;  %v477_v1 = vadd.s32 %v413_v58, %v1206_v8  ;;  %v478_v2 = vadd.s32 %v414_v59, %v1206_v8  ;;  %v366_v3 = vadd.s32 104, %v1208_v9 }
  0x48   : > { %1081 = vmatpush3.bf16.msk.msra.mxu1 %vm1080_vm8, %v1079_v50  ;;  %vm510_vm10 = vcmp.lt.s32.totalorder %v446_v62, 1032  ;;  %v429_v6 = vadd.s32 %v365_v0, %v1206_v8  ;;  %v1037_v7 = vpack.c.bf16 %v282_v61, %v281_v60  ;;  %v397_v10 = vadd.s32 352, %v1208_v9  ;;  %v268_v50 = vld [vmem:[%s1191_s21 + $0x18] sm:$0xff]  ;;  %v609_v60 = vld [vmem:[#allocation2] sm:$0xff] }
  0x49   : > { %vm1035_vm11 = vmpackc.low %vm510_vm10, %vm509_vm9  ;;  %vm541_vm12 = vcmp.lt.s32.totalorder %v477_v1, 1032  ;;  %vm542_vm13 = vcmp.lt.s32.totalorder %v478_v2, 1032  ;;  %v430_v13 = vadd.s32 %v366_v3, %v1206_v8  ;;  %v398_v14 = vadd.s32 360, %v1208_v9 }
  0x4a   : > { %1036 = vmatprep.subr.msk.bf16.mxu0 %vm1035_vm11, %v1034_v56  ;;  %vm1083_vm14 = vmpackc.low %vm542_vm13, %vm541_vm12  ;;  %vm493_vm15 = vcmp.lt.s32.totalorder %v429_v6, 1032  ;;  %v461_v15 = vadd.s32 %v397_v10, %v1206_v8  ;;  %v1085_v17 = vpack.c.bf16 %v314_v5, %v313_v4  ;;  %v383_v18 = vadd.s32 240, %v1208_v9 }
  0x4b   : > { %1084 = vmatprep.subr.msk.bf16.mxu1 %vm1083_vm14, %v1082_v63  ;;  %vm494_vm0 = vcmp.lt.s32.totalorder %v430_v13, 1032  ;;  %v462_v21 = vadd.s32 %v398_v14, %v1206_v8  ;;  %v384_v22 = vadd.s32 248, %v1208_v9  ;;  %v1040_v23 = vpack.c.bf16 %v300_v12, %v299_v11  ;;  %v924_v63 = vld [vmem:[%s1431_s2] ss:$0 sm:$0xff] (!%p923_p7) }
  0x4c   : > { %vm1038_vm1 = vmpackc.low %vm494_vm0, %vm493_vm15  ;;  %vm525_vm2 = vcmp.lt.s32.totalorder %v461_v15, 1032  ;;  %v447_v24 = vadd.s32 %v383_v18, %v1206_v8  ;;  %v415_v25 = vadd.s32 496, %v1208_v9  ;;  %v416_v26 = vadd.s32 504, %v1208_v9 }
  0x4d   : > { %1039 = vmatpush3.bf16.msk.msra.mxu0 %vm1038_vm1, %v1037_v7  ;;  %vm526_vm3 = vcmp.lt.s32.totalorder %v462_v21, 1032  ;;  %v448_v29 = vadd.s32 %v384_v22, %v1206_v8  ;;  %v1088_v30 = vpack.c.bf16 %v332_v20, %v331_v19  ;;  %v367_v31 = vadd.s32 112, %v1208_v9 }
  0x4e   : > { %vm1086_vm4 = vmpackc.low %vm526_vm3, %vm525_vm2  ;;  %vm511_vm5 = vcmp.lt.s32.totalorder %v447_v24, 1032  ;;  %v479_v32 = vadd.s32 %v415_v25, %v1206_v8  ;;  %v480_v33 = vadd.s32 %v416_v26, %v1206_v8  ;;  %v368_v34 = vadd.s32 120, %v1208_v9 }
  0x4f   : > { %1087 = vmatpush3.bf16.msk.msra.mxu1 %vm1086_vm4, %v1085_v17  ;;  %vm512_vm6 = vcmp.lt.s32.totalorder %v448_v29, 1032  ;;  %v431_v37 = vadd.s32 %v367_v31, %v1206_v8  ;;  %v1043_v38 = vpack.c.bf16 %v284_v28, %v283_v27  ;;  %v399_v39 = vadd.s32 368, %v1208_v9 }
  0x50   : > { %vm1041_vm7 = vmpackc.low %vm512_vm6, %vm511_vm5  ;;  %vm543_vm8 = vcmp.lt.s32.totalorder %v479_v32, 1032  ;;  %vm544_vm9 = vcmp.lt.s32.totalorder %v480_v33, 1032  ;;  %v432_v40 = vadd.s32 %v368_v34, %v1206_v8  ;;  %v400_v41 = vadd.s32 376, %v1208_v9  ;;  %v266_v9 = vld [vmem:[%s1191_s21 + $0x8] sm:$0xff] }
  0x51   : > { %1042 = vmatprep.subr.msk.bf16.mxu0 %vm1041_vm7, %v1040_v23  ;;  %vm1089_vm10 = vmpackc.low %vm544_vm9, %vm543_vm8  ;;  %vm495_vm11 = vcmp.lt.s32.totalorder %v431_v37, 1032  ;;  %v463_v42 = vadd.s32 %v399_v39, %v1206_v8  ;;  %v1091_v43 = vpack.c.bf16 %v316_v36, %v315_v35  ;;  %v336_v44 = vadd.s32 128, %v1212_v16 }
  0x52   : > { %1090 = vmatprep.subr.msk.bf16.mxu1 %vm1089_vm10, %v1088_v30  ;;  %vm496_vm12 = vcmp.lt.s32.totalorder %v432_v40, 1032  ;;  %v464_v45 = vadd.s32 %v400_v41, %v1206_v8  ;;  %v338_v46 = vadd.s32 384, %v1212_v16  ;;  %v340_v47 = vadd.s32 %v1206_v8, %v1212_v16 }
  0x53   : > { %vm1044_vm13 = vmpackc.low %vm496_vm12, %vm495_vm11  ;;  %vm527_vm14 = vcmp.lt.s32.totalorder %v463_v42, 1032  ;;  %v341_v48 = vadd.s32 %v1206_v8, %v336_v44  ;;  %v337_v49 = vadd.s32 256, %v1212_v16  ;;  %vm751_vm5 = vcmask 261120  }
  0x54   : > { %1045 = vmatpush3.bf16.msk.msra.mxu0 %vm1044_vm13, %v1043_v38  ;;  %vm528_vm15 = vcmp.lt.s32.totalorder %v464_v45, 1032  ;;  %v343_v51 = vadd.s32 %v1206_v8, %v338_v46  ;;  %vm344_vm0 = vcmp.lt.s32.totalorder %v340_v47, 1032 }
  0x55   : > { %vm1092_vm1 = vmpackc.low %vm528_vm15, %vm527_vm14  ;;  %vm345_vm2 = vcmp.lt.s32.totalorder %v341_v48, 1032  ;;  %v342_v53 = vadd.s32 %v1206_v8, %v337_v49 }
  0x56   : > { %1093 = vmatpush3.bf16.msk.msra.mxu1 %vm1092_vm1, %v1091_v43  ;;  %887 = vmatprep.mubr.msk.f32.mxu0 %vm345_vm2, %v266_v9  ;;  %vm347_vm3 = vcmp.lt.s32.totalorder %v343_v51, 1032 }
  0x57   : > { %921 = vmatprep.mubr.msk.f32.mxu1 %vm347_vm3, %v268_v50  ;;  %888 = vmatmul.mubr.msk.f32.vlgmr.msra.gmra.mrb[0].mxu0 %vm344_vm0, %v265_v52  ;;  %vm346_vm4 = vcmp.lt.s32.totalorder %v342_v53, 1032 }
  0x59   : > { %922 = vmatmul.mubr.msk.f32.vlgmr.msra.gmra.mrb[0].mxu1 %vm346_vm4, %v267_v54 }
 0x12a   : > { %v960_v16 = vpop.f32.mrb[0].mxu0 }
 0x12b   : > { %v961_v55 = vpop.f32.mrb[1].mxu0 }
 0x12c   : > { %v995_v56 = vpop.f32.mrb[0].mxu1  ;;  %v962_v57 = vadd.f32 %v961_v55, %v960_v16 }
 0x12d   : > { %v996_v58 = vpop.f32.mrb[1].mxu1 }
 0x12e   : > { %v997_v59 = vadd.f32 %v996_v58, %v995_v56  ;;  %756 = sbr.rel (%p923_p7) target bundleno = 330 (0x14a), region = 40 }
 0x130   : > { %v747_v61 = vadd.f32 %v997_v59, %v962_v57 }
 0x132   : > { %v750_v62 = vadd.f32 %v747_v61, %v609_v60 }
 0x134   : > { %752 = vst.msk [vmem:[#allocation2] sm:$0xff] %vm751_vm5, %v750_v62 }
 0x13b   : > { %v757_v8 = vld [vmem:[#allocation2] sm:$0xff] }
 0x13c   : > { %v765_v0 = vadd.f32 %v924_v63, %v757_v8 }
 0x13e   : > { %1119 = vtanh.f32 %v765_v0 }
 0x148   : > { %v1120_v1 = vpop.eup %1119 }
 0x149   : > { %767 = vst.msk [vmem:[%s1432_s3] sm:$0xff] %vm751_vm5, %v1120_v1 }
 0x14a PF: > { %s13_s14 = sadd.s32 1, %s1143_s14   ;;  %s1433_s12 = smov %s1139_s13 }
 0x14b   : > { %p10_p8 = scmp.ge.s32.totalorder %s13_s14, 5   ;;  %s1434_s13 = smov %s1436_s15 }
 0x14d   :  { %12 = sbr.rel (!%p10_p8) target bundleno = 2 (0x2), region = 73 }

// kernel: fwd_pallas.13
= control target key start
LH: loop header
LB: loop body
LE: loop exit
PB: predicated region body
PF: predicated region fallthrough
CT: control target
= control target key end

     0   :  { %vm18_vm0 = vcmask 130048   ;;  %v147_v0 = vmov 0.0|0.0   ;;  %v148_v4 = vmov 0.0   ;;  %vm149_vm1 = vmmov 0   ;;  %s194_s1 = inlined_call_operand.vmem [shape: f32[32,16], index: 1, kind: input, shape index: {}]   ;;  %s195_s0 = inlined_call_operand.vmem [shape: f32[8,32], index: 0, kind: input, shape index: {}]   ;;  %s196_s2 = inlined_call_operand.vmem [shape: f32[1,16], index: 2, kind: input, shape index: {}]   ;;  %s197_s3 = inlined_call_operand.vmem [shape: f32[8,16], index: 3, kind: output, shape index: {}]  }
   0x1   :  { %138 = vmatprep.subr.bf16.mxu0 %v147_v0  ;;  %v21_v1 = vld [vmem:[%s194_s1] sm:$0xff]  ;;  %v22_v2 = vld [vmem:[%s194_s1 + $0x8] sm:$0xff]  ;;  %v23_v3 = vld [vmem:[%s194_s1 + $0x10] sm:$0xff]  ;;  %19 = vst.msk [vmem:[#allocation2] sm:$0xff] %vm18_vm0, %v148_v4  ;;  %135 = vmatprep.mubr.msk.f32.mxu0 %vm149_vm1, %v148_v4  ;;  %vm26_vm2 = vcmask 261120  }
   0x2   :  { %v139_v5 = vpack.c.bf16 %v22_v2, %v21_v1  ;;  %v24_v6 = vld [vmem:[%s194_s1 + $0x18] sm:$0xff]  ;;  %v20_v8 = vld [vmem:[%s195_s0] sm:$0xff] }
   0x3   :  { %v142_v7 = vpack.c.bf16 %v24_v6, %v23_v3  ;;  %v121_v13 = vld [vmem:[%s196_s2] ss:$0 sm:$0xff] }
   0x4   :  { %140 = vmatpush3.bf16.msra.mxu0 %v139_v5 }
   0x5   :  { %141 = vmatprep.subr.bf16.mxu0 %v147_v0 }
   0x8   :  { %143 = vmatpush3.bf16.msra.mxu0 %v142_v7  ;;  %v25_v9 = vld [vmem:[#allocation2] sm:$0xff] }
   0xb   :  { %136 = vmatmul.mubr.msk.f32.vlgmr.msra.gmra.mrb[0].mxu0 %vm26_vm2, %v20_v8 }
  0xde   :  { %v96_v10 = vpop.f32.mrb[0].mxu0 }
  0xdf   :  { %v100_v11 = vadd.f32 %v96_v10, %v25_v9  ;;  %v137_v12 = vpop.f32.mrb[1].mxu0 }
  0xe1   :  { %102 = vst.msk [vmem:[#allocation2] sm:$0xff] %vm18_vm0, %v100_v11 }
  0xe8   :  { %v106_v14 = vld [vmem:[#allocation2] sm:$0xff] }
  0xe9   :  { %v114_v15 = vadd.f32 %v121_v13, %v106_v14 }
  0xeb   :  { %115 = vst.msk [vmem:[%s197_s3] sm:$0xff] %vm18_vm0, %v114_v15 }

// kernel: fwd_pallas.14
= control target key start
LH: loop header
LB: loop body
LE: loop exit
PB: predicated region body
PF: predicated region fallthrough
CT: control target
= control target key end

     0   :  { %vm34_vm0 = vcmask 64512   ;;  %vm39_vm1 = vcmask 7168   ;;  %s92_s3 = inlined_call_operand.vmem [shape: f32[8,8], index: 3, kind: input, shape index: {}]   ;;  %s93_s1 = inlined_call_operand.vmem [shape: f32[8,8], index: 1, kind: input, shape index: {}]   ;;  %s94_s0 = inlined_call_operand.vmem [shape: f32[8,8], index: 0, kind: input, shape index: {}]   ;;  %s95_s2 = inlined_call_operand.vmem [shape: f32[8,8], index: 2, kind: input, shape index: {}]   ;;  %s96_s4 = inlined_call_operand.vmem [shape: f32[8,1], index: 4, kind: output, shape index: {}]  }
   0x1   :  { %v20_v0 = vld [vmem:[%s92_s3] sm:$0xff] }
   0x2   :  { %v26_v1 = vmul.f32 1.442695, %v20_v0  ;;  %v18_v2 = vld [vmem:[%s93_s1] sm:$0xff] }
   0x3   :  { %v21_v3 = vmul.f32 1.442695, %v18_v2  ;;  %v17_v4 = vld [vmem:[%s94_s0] sm:$0xff] }
   0x4   :  { %46 = vpow2.f32 %v26_v1  ;;  %v19_v5 = vld [vmem:[%s95_s2] sm:$0xff] }
   0x5   :  { %48 = vpow2.f32 %v21_v3  ;;  %v23_v8 = vsub.f32 %v17_v4, %v19_v5 }
   0x7   :  { %v24_v9 = vmul.f32 %v23_v8, %v23_v8 }
   0xe   :  { %v47_v6 = vpop.eup %46 }
   0xf   :  { %v28_v7 = vadd.f32 1e-06, %v47_v6  ;;  %v49_v10 = vpop.eup %48 }
  0x10   :  { %v25_v11 = vadd.f32 %v49_v10, %v24_v9 }
  0x11   :  { %50 = vrcp.f32 %v28_v7 }
  0x1b   :  { %v51_v12 = vpop.eup %50 }
  0x1c   :  { %v30_v13 = vmul.f32 %v51_v12, %v25_v11 }
  0x1e   :  { %v45_v14 = vadd.f32 -1.0, %v30_v13 }
  0x20   :  { %v32_v15 = vadd.f32 %v45_v14, %v20_v0 }
  0x22   :  { %v33_v16 = vsub.f32 %v32_v15, %v18_v2 }
  0x24   :  { %v35_v17 = vsel %vm34_vm0, %v33_v16, 0.0 }
  0x25   :  { %36 = vadd.xlane.f32.xlu0 %v35_v17 }
  0xb2   :  { %v37_v18 = vpop.xlane.xlu0 %36 }
  0xb3   :  { %v38_v19 = vmul.f32 0.5, %v37_v18 }
  0xb5   :  { %40 = vst.msk [vmem:[%s96_s4] sm:$0xff] %vm39_vm1, %v38_v19 }

// kernel: fwd_pallas.15
= control target key start
LH: loop header
LB: loop body
LE: loop exit
PB: predicated region body
PF: predicated region fallthrough
CT: control target
= control target key end

     0   :  { %v527_v3 = vmov 0.0   ;;  %vm53_vm0 = vcmask 261120   ;;  %vm17_vm1 = vcmask 7168   ;;  %v528_v50 = vmov -inf   ;;  %s690_s1 = inlined_call_operand.vmem [shape: f32[32,1024], index: 1, kind: input, shape index: {}]   ;;  %s691_s0 = inlined_call_operand.vmem [shape: f32[8,32], index: 0, kind: input, shape index: {}]   ;;  %s692_s2 = inlined_call_operand.vmem [shape: f32[8,1024], index: 2, kind: output, shape index: {0}]   ;;  %s693_s3 = inlined_call_operand.vmem [shape: f32[8,1], index: 3, kind: output, shape index: {1}]  }
   0x1   :  { %v22_v0 = vld [vmem:[%s690_s1 + $0x8] sm:$0xff]  ;;  %v24_v2 = vld [vmem:[%s690_s1 + $0x18] sm:$0xff]  ;;  %121 = vmatprep.mubr.f32.mxu0 %v527_v3  ;;  %192 = vmatprep.mubr.f32.mxu1 %v527_v3  ;;  %v21_v6 = vld [vmem:[%s690_s1] sm:$0xff]  ;;  %18 = vst.msk [vmem:[#allocation2] sm:$0xff] %vm17_vm1, %v528_v50 }
   0x2   :  { %v30_v1 = vld [vmem:[%s690_s1 + $0x48] sm:$0xff]  ;;  %v32_v5 = vld [vmem:[%s690_s1 + $0x58] sm:$0xff]  ;;  %v29_v7 = vld [vmem:[%s690_s1 + $0x40] sm:$0xff]  ;;  %19 = vst.msk [vmem:[#allocation3] sm:$0xff] %vm17_vm1, %v527_v3 }
   0x3   :  { %v471_v4 = vpack.c.bf16 %v30_v1, %v22_v0  ;;  %v479_v8 = vpack.c.bf16 %v32_v5, %v24_v2  ;;  %v473_v9 = vpack.c.bf16 %v29_v7, %v21_v6  ;;  %v23_v10 = vld [vmem:[%s690_s1 + $0x10] sm:$0xff]  ;;  %v38_v12 = vld [vmem:[%s690_s1 + $0x88] sm:$0xff]  ;;  %v40_v15 = vld [vmem:[%s690_s1 + $0x98] sm:$0xff]  ;;  %v529_v2 = vmov 0  }
   0x4   :  { %v31_v11 = vld [vmem:[%s690_s1 + $0x50] sm:$0xff]  ;;  %v46_v14 = vld [vmem:[%s690_s1 + $0xc8] sm:$0xff]  ;;  %v48_v16 = vld [vmem:[%s690_s1 + $0xd8] sm:$0xff]  ;;  %506 = vset.pattern.permute.xlu0 %v529_v2 }
   0x5   :  { %472 = vmatprep.subr.bf16.mxu0 %v471_v4  ;;  %v481_v13 = vpack.c.bf16 %v31_v11, %v23_v10  ;;  %480 = vmatprep.subr.bf16.mxu1 %v479_v8  ;;  %v475_v17 = vpack.c.bf16 %v46_v14, %v38_v12  ;;  %v483_v18 = vpack.c.bf16 %v48_v16, %v40_v15  ;;  %v37_v19 = vld [vmem:[%s690_s1 + $0x80] sm:$0xff]  ;;  %v39_v21 = vld [vmem:[%s690_s1 + $0x90] sm:$0xff]  ;;  %v26_v24 = vld [vmem:[%s690_s1 + $0x28] sm:$0xff] }
   0x6   :  { %474 = vmatpush1.bf16.msra.mxu0 %v473_v9  ;;  %v45_v20 = vld [vmem:[%s690_s1 + $0xc0] sm:$0xff]  ;;  %v47_v23 = vld [vmem:[%s690_s1 + $0xd0] sm:$0xff]  ;;  %v34_v27 = vld [vmem:[%s690_s1 + $0x68] sm:$0xff] }
   0x7   :  { %482 = vmatpush1.bf16.msra.mxu1 %v481_v13  ;;  %v477_v22 = vpack.c.bf16 %v45_v20, %v37_v19  ;;  %476 = vmatprep.subr.bf16.mxu0 %v475_v17  ;;  %v485_v25 = vpack.c.bf16 %v47_v23, %v39_v21  ;;  %v20_v26 = vld [vmem:[%s691_s0] sm:$0xff]  ;;  %v28_v28 = vld [vmem:[%s690_s1 + $0x38] sm:$0xff]  ;;  %v487_v30 = vpack.c.bf16 %v34_v27, %v26_v24  ;;  %v27_v34 = vld [vmem:[%s690_s1 + $0x30] sm:$0xff] }
   0x8   :  { %484 = vmatprep.subr.bf16.mxu1 %v483_v18  ;;  %v36_v29 = vld [vmem:[%s690_s1 + $0x78] sm:$0xff]  ;;  %v25_v32 = vld [vmem:[%s690_s1 + $0x20] sm:$0xff]  ;;  %v35_v36 = vld [vmem:[%s690_s1 + $0x70] sm:$0xff] }
   0x9   :  { %v495_v31 = vpack.c.bf16 %v36_v29, %v28_v28  ;;  %v33_v33 = vld [vmem:[%s690_s1 + $0x60] sm:$0xff]  ;;  %v42_v37 = vld [vmem:[%s690_s1 + $0xa8] sm:$0xff]  ;;  %v497_v39 = vpack.c.bf16 %v35_v36, %v27_v34  ;;  %v44_v41 = vld [vmem:[%s690_s1 + $0xb8] sm:$0xff] }
   0xa   :  { %478 = vmatpush1.bf16.msra.mxu0 %v477_v22  ;;  %v489_v35 = vpack.c.bf16 %v33_v33, %v25_v32  ;;  %v50_v38 = vld [vmem:[%s690_s1 + $0xe8] sm:$0xff]  ;;  %v52_v42 = vld [vmem:[%s690_s1 + $0xf8] sm:$0xff]  ;;  %v41_v43 = vld [vmem:[%s690_s1 + $0xa0] sm:$0xff] }
   0xb   :  { %486 = vmatpush1.bf16.msra.mxu1 %v485_v25  ;;  %488 = vmatprep.subr.bf16.mxu0 %v487_v30  ;;  %v491_v40 = vpack.c.bf16 %v50_v38, %v42_v37  ;;  %v499_v44 = vpack.c.bf16 %v52_v42, %v44_v41  ;;  %v49_v45 = vld [vmem:[%s690_s1 + $0xe0] sm:$0xff]  ;;  %v43_v46 = vld [vmem:[%s690_s1 + $0xb0] sm:$0xff]  ;;  %v387_v41 = vld [vmem:[#allocation3] sm:$0xff] }
   0xc   :  { %496 = vmatprep.subr.bf16.mxu1 %v495_v31  ;;  %v51_v47 = vld [vmem:[%s690_s1 + $0xf0] sm:$0xff]  ;;  %v493_v48 = vpack.c.bf16 %v49_v45, %v41_v43 }
   0xd   :  { %467 = vmatmul.mubr.msk.f32.vlgmr.msra.gmra.mrb[0].mxu0 %vm53_vm0, %v20_v26  ;;  %v501_v49 = vpack.c.bf16 %v51_v47, %v43_v46 }
   0xe   :  { %468 = vmatmul.mubr.msk.f32.vlgmr.msra.gmra.mrb[0].mxu1 %vm53_vm0, %v20_v26  ;;  %490 = vmatpush1.bf16.msra.mxu0 %v489_v35 }
   0xf   :  { %498 = vmatpush1.bf16.msra.mxu1 %v497_v39  ;;  %492 = vmatprep.subr.bf16.mxu0 %v491_v40 }
  0x10   :  { %500 = vmatprep.subr.bf16.mxu1 %v499_v44  ;;  %263 = vmatprep.mubr.f32.mxu0 %v527_v3 }
  0x11   :  { %334 = vmatprep.mubr.f32.mxu1 %v527_v3  ;;  %v376_v3 = vld [vmem:[#allocation2] sm:$0xff] }
  0x12   :  { %494 = vmatpush1.bf16.msra.mxu0 %v493_v48 }
  0x13   :  { %502 = vmatpush1.bf16.msra.mxu1 %v501_v49 }
  0x15   :  { %469 = vmatmul.mubr.msk.f32.vlgmr.msra.gmra.mrb[2].mxu0 %vm53_vm0, %v20_v26 }
  0x16   :  { %470 = vmatmul.mubr.msk.f32.vlgmr.msra.gmra.mrb[2].mxu1 %vm53_vm0, %v20_v26 }
  0xe0   :  { %v123_v51 = vpop.f32.mrb[0].mxu0 }
  0xe1   :  { %442 = vst [vmem:[%s692_s2] sm:$0xff] %v123_v51  ;;  %v194_v52 = vpop.f32.mrb[0].mxu1  ;;  %v125_v53 = vpop.f32.mrb[1].mxu0 }
  0xe2   :  { %444 = vst [vmem:[%s692_s2 + $0x10] sm:$0xff] %v194_v52  ;;  %443 = vst [vmem:[%s692_s2 + $0x8] sm:$0xff] %v125_v53  ;;  %v196_v54 = vpop.f32.mrb[1].mxu1 }
  0xe3   :  { %445 = vst [vmem:[%s692_s2 + $0x18] sm:$0xff] %v196_v54 }
  0xe8   :  { %v265_v55 = vpop.f32.mrb[2].mxu0 }
  0xe9   :  { %v377_v56 = vmax.f32 %v123_v51, %v265_v55  ;;  %446 = vst [vmem:[%s692_s2 + $0x20] sm:$0xff] %v265_v55  ;;  %v336_v57 = vpop.f32.mrb[2].mxu1  ;;  %v267_v58 = vpop.f32.mrb[3].mxu0 }
  0xea   :  { %v379_v59 = vmax.f32 %v194_v52, %v336_v57  ;;  %448 = vst [vmem:[%s692_s2 + $0x30] sm:$0xff] %v336_v57  ;;  %v378_v60 = vmax.f32 %v125_v53, %v267_v58  ;;  %447 = vst [vmem:[%s692_s2 + $0x28] sm:$0xff] %v267_v58  ;;  %v338_v61 = vpop.f32.mrb[3].mxu1 }
  0xeb   :  { %v380_v62 = vmax.f32 %v196_v54, %v338_v61  ;;  %449 = vst [vmem:[%s692_s2 + $0x38] sm:$0xff] %v338_v61 }
  0xec   :  { %v381_v63 = vmax.f32 %v377_v56, %v378_v60 }
  0xed   :  { %v382_v0 = vmax.f32 %v379_v59, %v380_v62 }
  0xef   :  { %v383_v1 = vmax.f32 %v381_v63, %v382_v0 }
  0xf1   :  { %384 = vmax.xlane.f32.xlu0 %v383_v1 }
 0x17e   :  { %v385_v4 = vpop.xlane.xlu0 %384 }
 0x17f   :  { %v386_v5 = vmax.f32 %v376_v3, %v385_v4 }
 0x181   :  { %v388_v6 = vsub.f32 %v376_v3, %v386_v5  ;;  %433 = vst.msk [vmem:[#allocation2] sm:$0xff] %vm17_vm1, %v386_v5  ;;  %394 = vperm.xlu0 %506, %v386_v5  }
 0x183   :  { %v389_v39 = vmul.f32 1.442695, %v388_v6 }
 0x188   :  { %v453_v48 = vld [vmem:[#allocation2] sm:$0xff] }
 0x200   :  { %v395_v7 = vpop.permute.xlu0 %394 }
 0x201   :  { %v397_v8 = vsub.f32 %v123_v51, %v395_v7  ;;  %v398_v9 = vsub.f32 %v125_v53, %v395_v7  ;;  %v399_v10 = vsub.f32 %v194_v52, %v395_v7  ;;  %v400_v11 = vsub.f32 %v196_v54, %v395_v7 }
 0x202   :  { %v401_v14 = vsub.f32 %v265_v55, %v395_v7  ;;  %v402_v16 = vsub.f32 %v267_v58, %v395_v7  ;;  %v403_v19 = vsub.f32 %v336_v57, %v395_v7  ;;  %v404_v20 = vsub.f32 %v338_v61, %v395_v7 }
 0x203   :  { %v405_v12 = vmul.f32 1.442695, %v397_v8  ;;  %v407_v13 = vmul.f32 1.442695, %v398_v9  ;;  %v409_v15 = vmul.f32 1.442695, %v399_v10 }
 0x204   :  { %v411_v17 = vmul.f32 1.442695, %v400_v11  ;;  %v413_v18 = vmul.f32 1.442695, %v401_v14  ;;  %v415_v21 = vmul.f32 1.442695, %v402_v16 }
 0x205   :  { %507 = vpow2.f32 %v405_v12  ;;  %v417_v22 = vmul.f32 1.442695, %v403_v19  ;;  %v419_v23 = vmul.f32 1.442695, %v404_v20 }
 0x206   :  { %509 = vpow2.f32 %v407_v13 }
 0x207   :  { %511 = vpow2.f32 %v409_v15 }
 0x208   :  { %513 = vpow2.f32 %v411_v17 }
 0x209   :  { %515 = vpow2.f32 %v413_v18 }
 0x20a   :  { %517 = vpow2.f32 %v415_v21 }
 0x20b   :  { %519 = vpow2.f32 %v417_v22 }
 0x20c   :  { %521 = vpow2.f32 %v419_v23 }
 0x20d   :  { %523 = vpow2.f32 %v389_v39 }
 0x20f   :  { %v508_v24 = vpop.eup %507 }
 0x210   :  { %v510_v25 = vpop.eup %509 }
 0x211   :  { %v421_v26 = vadd.f32 %v510_v25, %v508_v24  ;;  %v512_v27 = vpop.eup %511 }
 0x212   :  { %v514_v29 = vpop.eup %513 }
 0x213   :  { %v422_v28 = vadd.f32 %v512_v27, %v421_v26  ;;  %v516_v31 = vpop.eup %515 }
 0x214   :  { %v518_v33 = vpop.eup %517 }
 0x215   :  { %v423_v30 = vadd.f32 %v514_v29, %v422_v28  ;;  %v520_v35 = vpop.eup %519 }
 0x216   :  { %v522_v37 = vpop.eup %521 }
 0x217   :  { %v424_v32 = vadd.f32 %v516_v31, %v423_v30  ;;  %v524_v40 = vpop.eup %523 }
 0x218   :  { %v391_v42 = vmul.f32 %v524_v40, %v387_v41 }
 0x219   :  { %v425_v34 = vadd.f32 %v518_v33, %v424_v32 }
 0x21b   :  { %v426_v36 = vadd.f32 %v520_v35, %v425_v34 }
 0x21d   :  { %v427_v38 = vadd.f32 %v522_v37, %v426_v36 }
 0x21f   :  { %428 = vadd.xlane.f32.xlu1 %v427_v38 }
 0x2ac   :  { %v429_v43 = vpop.xlane.xlu1 %428 }
 0x2ad   :  { %v430_v44 = vadd.f32 %v429_v43, %v391_v42 }
 0x2af   :  { %432 = vst.msk [vmem:[#allocation3] sm:$0xff] %vm17_vm1, %v430_v44 }
 0x2b6   :  { %v454_v45 = vld [vmem:[#allocation3] sm:$0xff] }
 0x2b7   :  { %525 = vlog2.f32 %v454_v45 }
 0x2c1   :  { %v526_v46 = vpop.eup %525 }
 0x2c2   :  { %v456_v47 = vmul.f32 0.6931472, %v526_v46 }
 0x2c4   :  { %v457_v49 = vadd.f32 %v456_v47, %v453_v48 }
 0x2c6   :  { %458 = vst.msk [vmem:[%s693_s3] sm:$0xff] %vm17_vm1, %v457_v49 }

// kernel: fwd_pallas.16
= control target key start
LH: loop header
LB: loop body
LE: loop exit
PB: predicated region body
PF: predicated region fallthrough
CT: control target
= control target key end

     0   :  { %v79_v0 = vmov 0   ;;  %s146_s1 = inlined_call_operand.vmem [shape: f32[8,1], index: 1, kind: input, shape index: {}]   ;;  %s147_s0 = inlined_call_operand.vmem [shape: f32[8,1024], index: 0, kind: input, shape index: {}]   ;;  %s148_s2 = inlined_call_operand.vmem [shape: f32[8,1024], index: 2, kind: output, shape index: {}]  }
   0x1   :  { %62 = vset.pattern.permute.xlu0 %v79_v0  ;;  %v19_v1 = vld [vmem:[%s146_s1] sm:$0xff]  ;;  %v12_v3 = vld [vmem:[%s147_s0 + $0x8] sm:$0xff]  ;;  %v13_v4 = vld [vmem:[%s147_s0 + $0x10] sm:$0xff] }
   0x2   :  { %22 = vperm.xlu0 %62, %v19_v1   ;;  %v11_v2 = vld [vmem:[%s147_s0] sm:$0xff]  ;;  %v14_v5 = vld [vmem:[%s147_s0 + $0x18] sm:$0xff]  ;;  %v16_v7 = vld [vmem:[%s147_s0 + $0x28] sm:$0xff] }
   0x3   :  { %v15_v6 = vld [vmem:[%s147_s0 + $0x20] sm:$0xff]  ;;  %v17_v9 = vld [vmem:[%s147_s0 + $0x30] sm:$0xff]  ;;  %v18_v10 = vld [vmem:[%s147_s0 + $0x38] sm:$0xff] }
  0x81   :  { %v23_v8 = vpop.permute.xlu0 %22 }
  0x82   :  { %v25_v11 = vsub.f32 %v11_v2, %v23_v8  ;;  %v26_v12 = vsub.f32 %v12_v3, %v23_v8  ;;  %v27_v13 = vsub.f32 %v13_v4, %v23_v8  ;;  %v28_v14 = vsub.f32 %v14_v5, %v23_v8 }
  0x83   :  { %v29_v15 = vsub.f32 %v15_v6, %v23_v8  ;;  %v30_v16 = vsub.f32 %v16_v7, %v23_v8  ;;  %v31_v17 = vsub.f32 %v17_v9, %v23_v8  ;;  %v32_v21 = vsub.f32 %v18_v10, %v23_v8 }
  0x84   :  { %v33_v18 = vmul.f32 1.442695, %v25_v11  ;;  %v35_v19 = vmul.f32 1.442695, %v26_v12  ;;  %v37_v20 = vmul.f32 1.442695, %v27_v13 }
  0x85   :  { %v39_v22 = vmul.f32 1.442695, %v28_v14  ;;  %v41_v23 = vmul.f32 1.442695, %v29_v15  ;;  %v43_v24 = vmul.f32 1.442695, %v30_v16 }
  0x86   :  { %63 = vpow2.f32 %v33_v18  ;;  %v45_v25 = vmul.f32 1.442695, %v31_v17  ;;  %v47_v26 = vmul.f32 1.442695, %v32_v21 }
  0x87   :  { %65 = vpow2.f32 %v35_v19 }
  0x88   :  { %67 = vpow2.f32 %v37_v20 }
  0x89   :  { %69 = vpow2.f32 %v39_v22 }
  0x8a   :  { %71 = vpow2.f32 %v41_v23 }
  0x8b   :  { %73 = vpow2.f32 %v43_v24 }
  0x8c   :  { %75 = vpow2.f32 %v45_v25 }
  0x8d   :  { %77 = vpow2.f32 %v47_v26 }
  0x90   :  { %v64_v27 = vpop.eup %63 }
  0x91   :  { %v66_v28 = vpop.eup %65  ;;  %49 = vst [vmem:[%s148_s2] sm:$0xff] %v64_v27 }
  0x92   :  { %v68_v29 = vpop.eup %67  ;;  %50 = vst [vmem:[%s148_s2 + $0x8] sm:$0xff] %v66_v28 }
  0x93   :  { %v70_v30 = vpop.eup %69  ;;  %51 = vst [vmem:[%s148_s2 + $0x10] sm:$0xff] %v68_v29 }
  0x94   :  { %v72_v31 = vpop.eup %71  ;;  %52 = vst [vmem:[%s148_s2 + $0x18] sm:$0xff] %v70_v30 }
  0x95   :  { %v74_v32 = vpop.eup %73  ;;  %53 = vst [vmem:[%s148_s2 + $0x20] sm:$0xff] %v72_v31 }
  0x96   :  { %v76_v33 = vpop.eup %75  ;;  %54 = vst [vmem:[%s148_s2 + $0x28] sm:$0xff] %v74_v32 }
  0x97   :  { %v78_v34 = vpop.eup %77  ;;  %55 = vst [vmem:[%s148_s2 + $0x30] sm:$0xff] %v76_v33 }
  0x98   :  { %56 = vst [vmem:[%s148_s2 + $0x38] sm:$0xff] %v78_v34 }

// kernel: fwd_pallas.17
= control target key start
LH: loop header
LB: loop body
LE: loop exit
PB: predicated region body
PF: predicated region fallthrough
CT: control target
= control target key end

     0   :  { %v431_v2 = vmov 0.0   ;;  %vm29_vm0 = vcmask 64512   ;;  %vm18_vm1 = vcmask 7168   ;;  %s501_s1 = inlined_call_operand.vmem [shape: f32[8,1024], index: 1, kind: input, shape index: {}]   ;;  %s502_s0 = inlined_call_operand.vmem [shape: f32[8,8], index: 0, kind: input, shape index: {}]   ;;  %s503_s2 = inlined_call_operand.vmem [shape: bf16[8,1024], index: 2, kind: input, shape index: {}]   ;;  %s504_s3 = inlined_call_operand.vmem [shape: f32[8,1], index: 3, kind: output, shape index: {}]  }
   0x1   :  { %v22_v0 = vld [vmem:[%s501_s1 + $0x8] sm:$0xff]  ;;  %v21_v1 = vld [vmem:[%s501_s1] sm:$0xff]  ;;  %97 = vmatprep.mubr.f32.mxu0 %v431_v2  ;;  %168 = vmatprep.mubr.f32.mxu1 %v431_v2  ;;  %v24_v4 = vld [vmem:[%s501_s1 + $0x18] sm:$0xff]  ;;  %19 = vst.msk [vmem:[#allocation2] sm:$0xff] %vm18_vm1, %v431_v2 }
   0x2   :  { %v20_v3 = vld [vmem:[%s502_s0] sm:$0xff]  ;;  %33 = vmatprep.subr.mxu0 %v22_v0  ;;  %v23_v5 = vld [vmem:[%s501_s1 + $0x10] sm:$0xff]  ;;  %v26_v6 = vld [vmem:[%s501_s1 + $0x28] sm:$0xff]  ;;  %104 = vmatprep.subr.mxu1 %v24_v4 }
   0x3   :  { %34 = vmatpush1.msra.mxu0 %v21_v1  ;;  %v25_v7 = vld [vmem:[%s501_s1 + $0x20] sm:$0xff]  ;;  %105 = vmatpush1.msra.mxu1 %v23_v5  ;;  %v28_v8 = vld [vmem:[%s501_s1 + $0x38] sm:$0xff]  ;;  %v27_v9 = vld [vmem:[%s501_s1 + $0x30] sm:$0xff] }
   0x4   :  { %410 = vmatmul.mubr.msk.f32.vlgmr.msra.gmra.mrb[0].mxu0 %vm29_vm0, %v20_v3  ;;  %411 = vmatmul.mubr.msk.f32.vlgmr.msra.gmra.mrb[0].mxu1 %vm29_vm0, %v20_v3  ;;  %v360_v18 = vld [vmem:[%s503_s2] sm:$0xff]  ;;  %v361_v19 = vld [vmem:[%s503_s2 + $0x8] sm:$0xff]  ;;  %v362_v26 = vld [vmem:[%s503_s2 + $0x10] sm:$0xff] }
   0x5   :  { %175 = vmatprep.subr.mxu0 %v26_v6  ;;  %239 = vmatprep.mubr.f32.mxu0 %v431_v2  ;;  %v364_v20 = vunpack.c.l.bf16 %v360_v18  ;;  %v365_v22 = vunpack.c.h.bf16 %v360_v18  ;;  %v366_v25 = vunpack.c.l.bf16 %v361_v19  ;;  %v367_v32 = vunpack.c.h.bf16 %v361_v19  ;;  %v363_v37 = vld [vmem:[%s503_s2 + $0x18] sm:$0xff] }
   0x6   :  { %176 = vmatpush1.msra.mxu0 %v25_v7  ;;  %246 = vmatprep.subr.mxu1 %v28_v8  ;;  %v368_v36 = vunpack.c.l.bf16 %v362_v26  ;;  %v369_v44 = vunpack.c.h.bf16 %v362_v26  ;;  %v370_v45 = vunpack.c.l.bf16 %v363_v37  ;;  %v371_v52 = vunpack.c.h.bf16 %v363_v37 }
   0x7   :  { %310 = vmatprep.mubr.f32.mxu1 %v431_v2  ;;  %247 = vmatpush1.msra.mxu1 %v27_v9 }
   0x8   :  { %412 = vmatmul.mubr.msk.f32.vlgmr.msra.gmra.mrb[2].mxu0 %vm29_vm0, %v20_v3  ;;  %413 = vmatmul.mubr.msk.f32.vlgmr.msra.gmra.mrb[2].mxu1 %vm29_vm0, %v20_v3  ;;  %v388_v61 = vld [vmem:[#allocation2] sm:$0xff] }
  0xd7   :  { %v99_v10 = vpop.f32.mrb[0].mxu0  ;;  %v170_v12 = vpop.f32.mrb[0].mxu1 }
  0xd8   :  { %415 = vlog2.f32 %v99_v10  ;;  %v101_v11 = vpop.f32.mrb[1].mxu0  ;;  %v172_v13 = vpop.f32.mrb[1].mxu1 }
  0xd9   :  { %417 = vlog2.f32 %v101_v11 }
  0xda   :  { %419 = vlog2.f32 %v170_v12 }
  0xdb   :  { %421 = vlog2.f32 %v172_v13  ;;  %v241_v14 = vpop.f32.mrb[2].mxu0  ;;  %v312_v16 = vpop.f32.mrb[2].mxu1 }
  0xdc   :  { %423 = vlog2.f32 %v241_v14  ;;  %v243_v15 = vpop.f32.mrb[3].mxu0  ;;  %v314_v17 = vpop.f32.mrb[3].mxu1 }
  0xdd   :  { %425 = vlog2.f32 %v243_v15 }
  0xde   :  { %427 = vlog2.f32 %v312_v16 }
  0xdf   :  { %429 = vlog2.f32 %v314_v17 }
  0xe2   :  { %v416_v21 = vpop.eup %415 }
  0xe3   :  { %v418_v23 = vpop.eup %417  ;;  %v345_v24 = vmul.f32 0.6931472, %v416_v21 }
  0xe4   :  { %v420_v27 = vpop.eup %419  ;;  %v347_v28 = vmul.f32 0.6931472, %v418_v23 }
  0xe5   :  { %v422_v29 = vpop.eup %421  ;;  %v372_v30 = vmul.f32 %v364_v20, %v345_v24  ;;  %v349_v31 = vmul.f32 0.6931472, %v420_v27 }
  0xe6   :  { %v424_v33 = vpop.eup %423  ;;  %v373_v34 = vmul.f32 %v365_v22, %v347_v28  ;;  %v351_v35 = vmul.f32 0.6931472, %v422_v29 }
  0xe7   :  { %v426_v38 = vpop.eup %425  ;;  %v374_v39 = vmul.f32 %v366_v25, %v349_v31  ;;  %v353_v40 = vmul.f32 0.6931472, %v424_v33 }
  0xe8   :  { %v428_v41 = vpop.eup %427  ;;  %v389_v42 = vadd.f32 %v373_v34, %v372_v30  ;;  %v375_v43 = vmul.f32 %v367_v32, %v351_v35  ;;  %v355_v48 = vmul.f32 0.6931472, %v426_v38 }
  0xe9   :  { %v376_v47 = vmul.f32 %v368_v36, %v353_v40  ;;  %v357_v49 = vmul.f32 0.6931472, %v428_v41  ;;  %v430_v50 = vpop.eup %429 }
  0xea   :  { %v390_v46 = vadd.f32 %v389_v42, %v374_v39  ;;  %v377_v53 = vmul.f32 %v369_v44, %v355_v48  ;;  %v359_v54 = vmul.f32 0.6931472, %v430_v50 }
  0xeb   :  { %v378_v55 = vmul.f32 %v370_v45, %v357_v49 }
  0xec   :  { %v391_v51 = vadd.f32 %v390_v46, %v375_v43  ;;  %v379_v58 = vmul.f32 %v371_v52, %v359_v54 }
  0xee   :  { %v392_v56 = vadd.f32 %v391_v51, %v376_v47 }
  0xf0   :  { %v393_v57 = vadd.f32 %v392_v56, %v377_v53 }
  0xf2   :  { %v394_v59 = vadd.f32 %v393_v57, %v378_v55 }
  0xf4   :  { %v395_v60 = vadd.f32 %v394_v59, %v379_v58 }
  0xf6   :  { %396 = vadd.xlane.f32.xlu0 %v395_v60 }
 0x183   :  { %v397_v62 = vpop.xlane.xlu0 %396 }
 0x184   :  { %v398_v63 = vsub.f32 %v388_v61, %v397_v62 }
 0x186   :  { %400 = vst.msk [vmem:[#allocation2] sm:$0xff] %vm18_vm1, %v398_v63 }
 0x18d   :  { %v404_v0 = vld [vmem:[#allocation2] sm:$0xff] }
 0x18e   :  { %405 = vst.msk [vmem:[%s504_s3] sm:$0xff] %vm18_vm1, %v404_v0 }

// kernel: fwd_pallas.9
= control target key start
LH: loop header
LB: loop body
LE: loop exit
PB: predicated region body
PF: predicated region fallthrough
CT: control target
= control target key end

     0   :  { %vm34_vm0 = vcmask 261120   ;;  %vm39_vm1 = vcmask 7168   ;;  %s92_s3 = inlined_call_operand.vmem [shape: f32[8,32], index: 3, kind: input, shape index: {}, may-alias: {2,3}]   ;;  %s93_s1 = inlined_call_operand.vmem [shape: f32[8,32], index: 1, kind: input, shape index: {}]   ;;  %s94_s0 = inlined_call_operand.vmem [shape: f32[8,32], index: 0, kind: input, shape index: {}]   ;;  %s95_s2 = inlined_call_operand.vmem [shape: f32[8,32], index: 2, kind: input, shape index: {}, may-alias: {2,3}]   ;;  %s96_s4 = inlined_call_operand.vmem [shape: f32[8,1], index: 4, kind: output, shape index: {}]  }
   0x1   :  { %v20_v0 = vld [vmem:[%s92_s3] sm:$0xff] }
   0x2   :  { %v26_v1 = vmul.f32 1.442695, %v20_v0  ;;  %v18_v2 = vld [vmem:[%s93_s1] sm:$0xff] }
   0x3   :  { %v21_v3 = vmul.f32 1.442695, %v18_v2  ;;  %v17_v4 = vld [vmem:[%s94_s0] sm:$0xff] }
   0x4   :  { %46 = vpow2.f32 %v26_v1  ;;  %v19_v5 = vld [vmem:[%s95_s2] sm:$0xff] }
   0x5   :  { %48 = vpow2.f32 %v21_v3  ;;  %v23_v8 = vsub.f32 %v17_v4, %v19_v5 }
   0x7   :  { %v24_v9 = vmul.f32 %v23_v8, %v23_v8 }
   0xe   :  { %v47_v6 = vpop.eup %46 }
   0xf   :  { %v28_v7 = vadd.f32 1e-06, %v47_v6  ;;  %v49_v10 = vpop.eup %48 }
  0x10   :  { %v25_v11 = vadd.f32 %v49_v10, %v24_v9 }
  0x11   :  { %50 = vrcp.f32 %v28_v7 }
  0x1b   :  { %v51_v12 = vpop.eup %50 }
  0x1c   :  { %v30_v13 = vmul.f32 %v51_v12, %v25_v11 }
  0x1e   :  { %v45_v14 = vadd.f32 -1.0, %v30_v13 }
  0x20   :  { %v32_v15 = vadd.f32 %v45_v14, %v20_v0 }
  0x22   :  { %v33_v16 = vsub.f32 %v32_v15, %v18_v2 }
  0x24   :  { %v35_v17 = vsel %vm34_vm0, %v33_v16, 0.0 }
  0x25   :  { %36 = vadd.xlane.f32.xlu0 %v35_v17 }
  0xb2   :  { %v37_v18 = vpop.xlane.xlu0 %36 }
  0xb3   :  { %v38_v19 = vmul.f32 0.5, %v37_v18 }
  0xb5   :  { %40 = vst.msk [vmem:[%s96_s4] sm:$0xff] %vm39_vm1, %v38_v19 }

</bundles_post_ra>
